<compile_context>
chip_gen: v7x
topology: tpu7x:2x2x1
jax: 0.10.0
libtpu: 0.0.40
codegen_flags: <defaults>
</compile_context>

<pallas_src>
import functools

import jax
import jax.numpy as jnp
from jax.experimental import pallas as pl
from jax.experimental.pallas import tpu as pltpu


def _round_up(x, m):
    return (x + m - 1) // m * m


def unet_up_kernel(p_ref, w_ref, out_ref, acc_ref, *, eps):
    """Phase-decomposed ConvTranspose2d(4,2,1) -> InstanceNorm2d -> ReLU.

    p_ref:   (1, 4, HW, Kp)  bf16  pre-built im2col patches, one per output phase
    w_ref:   (4, Kp, Cp)     bf16  phase-decomposed weight (K and Cout zero-padded)
    out_ref: (1, 4, HW, Cp)  bf16  normalized + ReLU'd conv result (phase-separated)
    acc_ref: (4, HW, Cp)     f32   VMEM scratch holding the raw conv result
    """
    hw = acc_ref.shape[1]
    cp = acc_ref.shape[2]

    # Pass 1: one lane-dense MXU matmul per phase, raw f32 result to scratch,
    # streamed per-channel sums (sublane reduction on the XLU).
    ssum = jnp.zeros((1, cp), jnp.float32)
    for ph in range(4):
        y = jnp.dot(p_ref[0, ph], w_ref[ph], preferred_element_type=jnp.float32)
        acc_ref[ph] = y
        ssum = ssum + jnp.sum(y, axis=0, keepdims=True)

    inv_cnt = 1.0 / float(4 * hw)
    mean = ssum * inv_cnt                                    # (1, Cp)

    # Pass 2: centered sum of squares (cancellation-safe vs E[x^2]-E[x]^2).
    ssq = jnp.zeros((1, cp), jnp.float32)
    for ph in range(4):
        d = acc_ref[ph] - mean                               # sublane broadcast
        ssq = ssq + jnp.sum(d * d, axis=0, keepdims=True)
    scale = jax.lax.rsqrt(ssq * inv_cnt + eps)               # EUP rsqrt, (1, Cp)
    shift = -mean * scale
    # Zero-padded channels: mean=var=0 -> scale finite, shift=0, output stays 0.

    # Pass 3: normalize + ReLU, fused into the single bf16 store pass
    # (one store per vreg; important on v5e's single vst slot).
    for ph in range(4):
        v = acc_ref[ph] * scale + shift
        out_ref[0, ph] = jnp.maximum(v, 0.0).astype(out_ref.dtype)


def unet_up(x, skip_input, w_trans, *, eps=1e-5):
    """x: (N, Cin, H, W) NCHW.  skip_input: (N, Cskip, 2H, 2W).
    w_trans: (Cin, Cout, 4, 4) ConvTranspose2d weight (bias=False).
    Returns (N, Cout + Cskip, 2H, 2W) NCHW, like the PyTorch module."""
    N, Cin, H, W = x.shape
    Cout = w_trans.shape[1]
    OH, OW = 2 * H, 2 * W
    HW = H * W
    K = 4 * Cin
    Kp = _round_up(K, 128)       # lane-dense / MXU-aligned contraction dim
    Cp = _round_up(Cout, 128)    # lane-dense / MXU-aligned output channels

    # ---- wrapper XLA glue: NCHW -> NHWC, pad spatially by 1, cast to bf16 ----
    x_nhwc = jnp.transpose(x, (0, 2, 3, 1))
    x_pad = jnp.pad(x_nhwc, ((0, 0), (1, 1), (1, 1), (0, 0))).astype(jnp.bfloat16)

    # ---- im2col in the wrapper (small-Cin path): 4 output parity phases, each a
    # 2x2 window over the padded ORIGINAL-resolution input.  (N, 4, HW, K) ----
    # out(2a+py, 2b+px, co) = sum_{dy,dx,ci} x_pad[a+py+dy, b+px+dx, ci]
    #                                        * w_trans[ci, co, 3-py-2dy, 3-px-2dx]
    phase_patches = []
    for py in range(2):
        for px in range(2):
            taps = [x_pad[:, py + dy:py + dy + H, px + dx:px + dx + W, :]
                    for dy in range(2) for dx in range(2)]
            phase_patches.append(
                jnp.concatenate(taps, axis=-1).reshape(N, HW, K))
    patches = jnp.stack(phase_patches, axis=1)               # (N, 4, HW, K) bf16
    patches = jnp.pad(patches, ((0, 0), (0, 0), (0, 0), (0, Kp - K)))

    # ---- phase-decomposed weight, zero-padded to (4, Kp, Cp), bf16 ----
    w_list = []
    for py in range(2):
        for px in range(2):
            taps = [w_trans[:, :, 3 - py - 2 * dy, 3 - px - 2 * dx]
                    for dy in range(2) for dx in range(2)]
            w_list.append(jnp.concatenate(taps, axis=0))     # (4*Cin, Cout)
    w_ph = jnp.stack(w_list, axis=0)                          # (4, K, Cout)
    w_ph = jnp.pad(w_ph, ((0, 0), (0, Kp - K), (0, Cp - Cout))).astype(jnp.bfloat16)

    # ---- VMEM / cost bookkeeping ----
    patch_blk = 4 * HW * Kp * 2            # per-sample input block, bytes
    out_blk = 4 * HW * Cp * 2              # per-sample output block, bytes (bf16)
    w_bytes = 4 * Kp * Cp * 2
    scratch_bytes = 4 * HW * Cp * 4
    vmem_need = 2 * (patch_blk + out_blk + w_bytes) + scratch_bytes + (2 << 20)
    vmem_limit = int(min(max(vmem_need, 32 << 20), 64 << 20))
    cost = pl.CostEstimate(
        flops=2 * N * 4 * HW * Kp * Cp,
        transcendentals=N * Cp,
        bytes_accessed=N * (patch_blk + out_blk) + w_bytes,
    )

    kernel = functools.partial(unet_up_kernel, eps=eps)
    y_ph = pl.pallas_call(
        kernel,
        out_shape=jax.ShapeDtypeStruct((N, 4, HW, Cp), jnp.bfloat16),
        grid=(N,),
        in_specs=[
            pl.BlockSpec((1, 4, HW, Kp), lambda n: (n, 0, 0, 0)),
            pl.BlockSpec((4, Kp, Cp), lambda n: (0, 0, 0)),
        ],
        out_specs=pl.BlockSpec((1, 4, HW, Cp), lambda n: (n, 0, 0, 0)),
        scratch_shapes=[pltpu.VMEM((4, HW, Cp), jnp.float32)],
        compiler_params=pltpu.CompilerParams(
            dimension_semantics=("parallel",),
            vmem_limit_bytes=vmem_limit,
        ),
        cost_estimate=cost,
    )(patches, w_ph)

    # ---- wrapper XLA glue: drop channel padding, interleave phases, NHWC -> NCHW,
    # concat with skip.  Phase layout: y_ph[n, 2py+px, a*W+b, co]. ----
    y = y_ph[:, :, :, :Cout].reshape(N, 2, 2, H, W, Cout)    # (n, py, px, a, b, co)
    y = jnp.transpose(y, (0, 5, 3, 1, 4, 2)).reshape(N, Cout, OH, OW)
    return jnp.concatenate([y.astype(skip_input.dtype), skip_input], axis=1)


def unet_up_ref(x, skip_input, w_trans, eps=1e-5):
    """Pure-JAX reference (conv_general_dilated).  Inputs are rounded to bf16
    (matching the kernel's MXU input quantization, so products are exact) and the
    normalized result is rounded to bf16 (matching the kernel's output dtype),
    so the comparison isolates kernel correctness."""
    xq = x.astype(jnp.bfloat16).astype(jnp.float32)
    wq = w_trans.astype(jnp.bfloat16).astype(jnp.float32)
    w_conv = jnp.flip(jnp.transpose(wq, (1, 0, 2, 3)), axis=(2, 3))
    y = jax.lax.conv_general_dilated(
        xq, w_conv, window_strides=(1, 1), padding=((2, 2), (2, 2)),
        lhs_dilation=(2, 2), dimension_numbers=("NCHW", "OIHW", "NCHW"))
    mean = y.mean(axis=(2, 3), keepdims=True)
    var = ((y - mean) ** 2).mean(axis=(2, 3), keepdims=True)
    y = jnp.maximum((y - mean) * jax.lax.rsqrt(var + eps), 0.0)
    y = y.astype(jnp.bfloat16).astype(jnp.float32)
    return jnp.concatenate([y, skip_input.astype(jnp.float32)], axis=1)


if __name__ == "__main__":
    # Small shapes consistent with the module: in_size=4, out_size=4, H=W=16.
    N, in_size, out_size, H, W = 2, 4, 4, 16, 16
    key = jax.random.PRNGKey(0)
    k_x, k_s, k_w = jax.random.split(key, 3)

    x = jax.random.normal(k_x, (N, in_size, H, W), dtype=jnp.float32)
    skip = jax.random.normal(k_s, (N, out_size, 2 * H, 2 * W), dtype=jnp.float32)
    # ConvTranspose2d weight shape: (in_channels, out_channels, kH, kW), bias=False.
    w_trans = jax.random.normal(k_w, (in_size, out_size, 4, 4), dtype=jnp.float32) * 0.1

    fwd = jax.jit(unet_up)
    out = jax.block_until_ready(fwd(x, skip, w_trans))
    ref = unet_up_ref(x, skip, w_trans)

    assert out.shape == (N, 2 * out_size, 2 * H, 2 * W), out.shape
    # Kernel output is bf16 (one final rounding); allow ~1 bf16 ulp of slack on
    # top of f32 accumulation-order differences in the instance-norm statistics.
    assert jnp.allclose(out, ref, rtol=2e-2, atol=2e-2), "mismatch vs reference"

    print("KERNEL_OK")
</pallas_src>

<mosaic_0001>
module attributes {stable_mosaic.version = 11 : i64} {
  func.func @unet_up_kernel(%arg0: i32, %arg1: memref<1x4x256x128xbf16, #tpu.memory_space<vmem>>, %arg2: memref<4x128x128xbf16, #tpu.memory_space<vmem>>, %arg3: memref<1x4x256x128xbf16, #tpu.memory_space<vmem>>, %arg4: memref<4x256x128xf32, #tpu.memory_space<vmem>>) attributes {dimension_semantics = [#tpu.dimension_semantics<parallel>], iteration_bounds = array<i64: 2>, scalar_prefetch = 0 : i64, scratch_operands = 1 : i64, tpu.core_type = #tpu.core_type<tc>, window_params = [{transform_indices = @transform_0, window_bounds = array<i64: 1, 4, 256, 128>}, {pipeline_mode = #tpu.pipeline_mode<synchronous>, transform_indices = @transform_1, window_bounds = array<i64: 4, 128, 128>}, {transform_indices = @transform_2, window_bounds = array<i64: 1, 4, 256, 128>}]} {
    %cst = arith.constant 0.000000e+00 : f32
    %0 = vector.broadcast %cst : f32 to vector<1x128xf32>
    %c0 = arith.constant 0 : index
    %c0_0 = arith.constant 0 : index
    %c0_1 = arith.constant 0 : index
    %c0_2 = arith.constant 0 : index
    %1 = vector.load %arg1[%c0, %c0_0, %c0_1, %c0_2] : memref<1x4x256x128xbf16, #tpu.memory_space<vmem>>, vector<1x1x256x128xbf16>
    %2 = vector.shape_cast %1 : vector<1x1x256x128xbf16> to vector<256x128xbf16>
    %c0_3 = arith.constant 0 : index
    %c0_4 = arith.constant 0 : index
    %c0_5 = arith.constant 0 : index
    %3 = vector.load %arg2[%c0_3, %c0_4, %c0_5] : memref<4x128x128xbf16, #tpu.memory_space<vmem>>, vector<1x128x128xbf16>
    %4 = vector.shape_cast %3 : vector<1x128x128xbf16> to vector<128x128xbf16>
    %cst_6 = arith.constant dense<0.000000e+00> : vector<256x128xf32>
    %5 = tpu.matmul %2, %4, %cst_6 {dimension_numbers = #tpu.dot_dimension_numbers<[1], [0], [0], [1], [0, 0, 1, 1], [], []>} : vector<256x128xbf16>, vector<128x128xbf16>, vector<256x128xf32> -> vector<256x128xf32>
    %c0_7 = arith.constant 0 : index
    %c0_8 = arith.constant 0 : index
    %c0_9 = arith.constant 0 : index
    %6 = vector.load %arg4[%c0_7, %c0_8, %c0_9] : memref<4x256x128xf32, #tpu.memory_space<vmem>>, vector<1x256x128xf32>
    %7 = vector.shape_cast %6 : vector<1x256x128xf32> to vector<256x128xf32>
    %8 = vector.shape_cast %5 : vector<256x128xf32> to vector<1x256x128xf32>
    tpu.vector_store %arg4[%c0_7, %c0_8, %c0_9], %8 {strides = array<i32>} : memref<4x256x128xf32, #tpu.memory_space<vmem>>, vector<1x256x128xf32>,
    %cst_10 = arith.constant dense<0.000000e+00> : vector<128xf32>
    %9 = vector.multi_reduction <add>, %5, %cst_10 [0] : vector<256x128xf32> to vector<128xf32>
    %10 = vector.shape_cast %9 : vector<128xf32> to vector<1x128xf32>
    %11 = arith.addf %0, %10 : vector<1x128xf32>
    %c0_11 = arith.constant 0 : index
    %c1 = arith.constant 1 : index
    %c0_12 = arith.constant 0 : index
    %c0_13 = arith.constant 0 : index
    %12 = vector.load %arg1[%c0_11, %c1, %c0_12, %c0_13] : memref<1x4x256x128xbf16, #tpu.memory_space<vmem>>, vector<1x1x256x128xbf16>
    %13 = vector.shape_cast %12 : vector<1x1x256x128xbf16> to vector<256x128xbf16>
    %c1_14 = arith.constant 1 : index
    %c0_15 = arith.constant 0 : index
    %c0_16 = arith.constant 0 : index
    %14 = vector.load %arg2[%c1_14, %c0_15, %c0_16] : memref<4x128x128xbf16, #tpu.memory_space<vmem>>, vector<1x128x128xbf16>
    %15 = vector.shape_cast %14 : vector<1x128x128xbf16> to vector<128x128xbf16>
    %cst_17 = arith.constant dense<0.000000e+00> : vector<256x128xf32>
    %16 = tpu.matmul %13, %15, %cst_17 {dimension_numbers = #tpu.dot_dimension_numbers<[1], [0], [0], [1], [0, 0, 1, 1], [], []>} : vector<256x128xbf16>, vector<128x128xbf16>, vector<256x128xf32> -> vector<256x128xf32>
    %c1_18 = arith.constant 1 : index
    %c0_19 = arith.constant 0 : index
    %c0_20 = arith.constant 0 : index
    %17 = vector.load %arg4[%c1_18, %c0_19, %c0_20] : memref<4x256x128xf32, #tpu.memory_space<vmem>>, vector<1x256x128xf32>
    %18 = vector.shape_cast %17 : vector<1x256x128xf32> to vector<256x128xf32>
    %19 = vector.shape_cast %16 : vector<256x128xf32> to vector<1x256x128xf32>
    tpu.vector_store %arg4[%c1_18, %c0_19, %c0_20], %19 {strides = array<i32>} : memref<4x256x128xf32, #tpu.memory_space<vmem>>, vector<1x256x128xf32>,
    %cst_21 = arith.constant dense<0.000000e+00> : vector<128xf32>
    %20 = vector.multi_reduction <add>, %16, %cst_21 [0] : vector<256x128xf32> to vector<128xf32>
    %21 = vector.shape_cast %20 : vector<128xf32> to vector<1x128xf32>
    %22 = arith.addf %11, %21 : vector<1x128xf32>
    %c0_22 = arith.constant 0 : index
    %c2 = arith.constant 2 : index
    %c0_23 = arith.constant 0 : index
    %c0_24 = arith.constant 0 : index
    %23 = vector.load %arg1[%c0_22, %c2, %c0_23, %c0_24] : memref<1x4x256x128xbf16, #tpu.memory_space<vmem>>, vector<1x1x256x128xbf16>
    %24 = vector.shape_cast %23 : vector<1x1x256x128xbf16> to vector<256x128xbf16>
    %c2_25 = arith.constant 2 : index
    %c0_26 = arith.constant 0 : index
    %c0_27 = arith.constant 0 : index
    %25 = vector.load %arg2[%c2_25, %c0_26, %c0_27] : memref<4x128x128xbf16, #tpu.memory_space<vmem>>, vector<1x128x128xbf16>
    %26 = vector.shape_cast %25 : vector<1x128x128xbf16> to vector<128x128xbf16>
    %cst_28 = arith.constant dense<0.000000e+00> : vector<256x128xf32>
    %27 = tpu.matmul %24, %26, %cst_28 {dimension_numbers = #tpu.dot_dimension_numbers<[1], [0], [0], [1], [0, 0, 1, 1], [], []>} : vector<256x128xbf16>, vector<128x128xbf16>, vector<256x128xf32> -> vector<256x128xf32>
    %c2_29 = arith.constant 2 : index
    %c0_30 = arith.constant 0 : index
    %c0_31 = arith.constant 0 : index
    %28 = vector.load %arg4[%c2_29, %c0_30, %c0_31] : memref<4x256x128xf32, #tpu.memory_space<vmem>>, vector<1x256x128xf32>
    %29 = vector.shape_cast %28 : vector<1x256x128xf32> to vector<256x128xf32>
    %30 = vector.shape_cast %27 : vector<256x128xf32> to vector<1x256x128xf32>
    tpu.vector_store %arg4[%c2_29, %c0_30, %c0_31], %30 {strides = array<i32>} : memref<4x256x128xf32, #tpu.memory_space<vmem>>, vector<1x256x128xf32>,
    %cst_32 = arith.constant dense<0.000000e+00> : vector<128xf32>
    %31 = vector.multi_reduction <add>, %27, %cst_32 [0] : vector<256x128xf32> to vector<128xf32>
    %32 = vector.shape_cast %31 : vector<128xf32> to vector<1x128xf32>
    %33 = arith.addf %22, %32 : vector<1x128xf32>
    %c0_33 = arith.constant 0 : index
    %c3 = arith.constant 3 : index
    %c0_34 = arith.constant 0 : index
    %c0_35 = arith.constant 0 : index
    %34 = vector.load %arg1[%c0_33, %c3, %c0_34, %c0_35] : memref<1x4x256x128xbf16, #tpu.memory_space<vmem>>, vector<1x1x256x128xbf16>
    %35 = vector.shape_cast %34 : vector<1x1x256x128xbf16> to vector<256x128xbf16>
    %c3_36 = arith.constant 3 : index
    %c0_37 = arith.constant 0 : index
    %c0_38 = arith.constant 0 : index
    %36 = vector.load %arg2[%c3_36, %c0_37, %c0_38] : memref<4x128x128xbf16, #tpu.memory_space<vmem>>, vector<1x128x128xbf16>
    %37 = vector.shape_cast %36 : vector<1x128x128xbf16> to vector<128x128xbf16>
    %cst_39 = arith.constant dense<0.000000e+00> : vector<256x128xf32>
    %38 = tpu.matmul %35, %37, %cst_39 {dimension_numbers = #tpu.dot_dimension_numbers<[1], [0], [0], [1], [0, 0, 1, 1], [], []>} : vector<256x128xbf16>, vector<128x128xbf16>, vector<256x128xf32> -> vector<256x128xf32>
    %c3_40 = arith.constant 3 : index
    %c0_41 = arith.constant 0 : index
    %c0_42 = arith.constant 0 : index
    %39 = vector.load %arg4[%c3_40, %c0_41, %c0_42] : memref<4x256x128xf32, #tpu.memory_space<vmem>>, vector<1x256x128xf32>
    %40 = vector.shape_cast %39 : vector<1x256x128xf32> to vector<256x128xf32>
    %41 = vector.shape_cast %38 : vector<256x128xf32> to vector<1x256x128xf32>
    tpu.vector_store %arg4[%c3_40, %c0_41, %c0_42], %41 {strides = array<i32>} : memref<4x256x128xf32, #tpu.memory_space<vmem>>, vector<1x256x128xf32>,
    %cst_43 = arith.constant dense<0.000000e+00> : vector<128xf32>
    %42 = vector.multi_reduction <add>, %38, %cst_43 [0] : vector<256x128xf32> to vector<128xf32>
    %43 = vector.shape_cast %42 : vector<128xf32> to vector<1x128xf32>
    %44 = arith.addf %33, %43 : vector<1x128xf32>
    %cst_44 = arith.constant 9.765625E-4 : f32
    %45 = vector.broadcast %cst_44 : f32 to vector<1x128xf32>
    %46 = arith.mulf %44, %45 : vector<1x128xf32>
    %cst_45 = arith.constant 0.000000e+00 : f32
    %47 = vector.broadcast %cst_45 : f32 to vector<1x128xf32>
    %c0_46 = arith.constant 0 : index
    %c0_47 = arith.constant 0 : index
    %c0_48 = arith.constant 0 : index
    %48 = vector.load %arg4[%c0_46, %c0_47, %c0_48] : memref<4x256x128xf32, #tpu.memory_space<vmem>>, vector<1x256x128xf32>
    %49 = vector.shape_cast %48 : vector<1x256x128xf32> to vector<256x128xf32>
    %50 = vector.broadcast %46 : vector<1x128xf32> to vector<256x128xf32>
    %51 = arith.subf %49, %50 : vector<256x128xf32>
    %52 = arith.mulf %51, %51 : vector<256x128xf32>
    %cst_49 = arith.constant dense<0.000000e+00> : vector<128xf32>
    %53 = vector.multi_reduction <add>, %52, %cst_49 [0] : vector<256x128xf32> to vector<128xf32>
    %54 = vector.shape_cast %53 : vector<128xf32> to vector<1x128xf32>
    %55 = arith.addf %47, %54 : vector<1x128xf32>
    %c1_50 = arith.constant 1 : index
    %c0_51 = arith.constant 0 : index
    %c0_52 = arith.constant 0 : index
    %56 = vector.load %arg4[%c1_50, %c0_51, %c0_52] : memref<4x256x128xf32, #tpu.memory_space<vmem>>, vector<1x256x128xf32>
    %57 = vector.shape_cast %56 : vector<1x256x128xf32> to vector<256x128xf32>
    %58 = vector.broadcast %46 : vector<1x128xf32> to vector<256x128xf32>
    %59 = arith.subf %57, %58 : vector<256x128xf32>
    %60 = arith.mulf %59, %59 : vector<256x128xf32>
    %cst_53 = arith.constant dense<0.000000e+00> : vector<128xf32>
    %61 = vector.multi_reduction <add>, %60, %cst_53 [0] : vector<256x128xf32> to vector<128xf32>
    %62 = vector.shape_cast %61 : vector<128xf32> to vector<1x128xf32>
    %63 = arith.addf %55, %62 : vector<1x128xf32>
    %c2_54 = arith.constant 2 : index
    %c0_55 = arith.constant 0 : index
    %c0_56 = arith.constant 0 : index
    %64 = vector.load %arg4[%c2_54, %c0_55, %c0_56] : memref<4x256x128xf32, #tpu.memory_space<vmem>>, vector<1x256x128xf32>
    %65 = vector.shape_cast %64 : vector<1x256x128xf32> to vector<256x128xf32>
    %66 = vector.broadcast %46 : vector<1x128xf32> to vector<256x128xf32>
    %67 = arith.subf %65, %66 : vector<256x128xf32>
    %68 = arith.mulf %67, %67 : vector<256x128xf32>
    %cst_57 = arith.constant dense<0.000000e+00> : vector<128xf32>
    %69 = vector.multi_reduction <add>, %68, %cst_57 [0] : vector<256x128xf32> to vector<128xf32>
    %70 = vector.shape_cast %69 : vector<128xf32> to vector<1x128xf32>
    %71 = arith.addf %63, %70 : vector<1x128xf32>
    %c3_58 = arith.constant 3 : index
    %c0_59 = arith.constant 0 : index
    %c0_60 = arith.constant 0 : index
    %72 = vector.load %arg4[%c3_58, %c0_59, %c0_60] : memref<4x256x128xf32, #tpu.memory_space<vmem>>, vector<1x256x128xf32>
    %73 = vector.shape_cast %72 : vector<1x256x128xf32> to vector<256x128xf32>
    %74 = vector.broadcast %46 : vector<1x128xf32> to vector<256x128xf32>
    %75 = arith.subf %73, %74 : vector<256x128xf32>
    %76 = arith.mulf %75, %75 : vector<256x128xf32>
    %cst_61 = arith.constant dense<0.000000e+00> : vector<128xf32>
    %77 = vector.multi_reduction <add>, %76, %cst_61 [0] : vector<256x128xf32> to vector<128xf32>
    %78 = vector.shape_cast %77 : vector<128xf32> to vector<1x128xf32>
    %79 = arith.addf %71, %78 : vector<1x128xf32>
    %cst_62 = arith.constant 9.765625E-4 : f32
    %80 = vector.broadcast %cst_62 : f32 to vector<1x128xf32>
    %81 = arith.mulf %79, %80 : vector<1x128xf32>
    %cst_63 = arith.constant 9.99999974E-6 : f32
    %82 = vector.broadcast %cst_63 : f32 to vector<1x128xf32>
    %83 = arith.addf %81, %82 : vector<1x128xf32>
    %84 = math.rsqrt %83 : vector<1x128xf32>
    %cst_64 = arith.constant 0.000000e+00 : f32
    %85 = vector.broadcast %cst_64 : f32 to vector<1x128xf32>
    %86 = arith.subf %85, %46 : vector<1x128xf32>
    %87 = arith.mulf %86, %84 : vector<1x128xf32>
    %c0_65 = arith.constant 0 : index
    %c0_66 = arith.constant 0 : index
    %c0_67 = arith.constant 0 : index
    %88 = vector.load %arg4[%c0_65, %c0_66, %c0_67] : memref<4x256x128xf32, #tpu.memory_space<vmem>>, vector<1x256x128xf32>
    %89 = vector.shape_cast %88 : vector<1x256x128xf32> to vector<256x128xf32>
    %90 = vector.broadcast %84 : vector<1x128xf32> to vector<256x128xf32>
    %91 = arith.mulf %89, %90 : vector<256x128xf32>
    %92 = vector.broadcast %87 : vector<1x128xf32> to vector<256x128xf32>
    %93 = arith.addf %91, %92 : vector<256x128xf32>
    %cst_68 = arith.constant 0.000000e+00 : f32
    %94 = vector.broadcast %cst_68 : f32 to vector<256x128xf32>
    %95 = arith.maximumf %93, %94 : vector<256x128xf32>
    %96 = arith.truncf %95 : vector<256x128xf32> to vector<256x128xbf16>
    %c0_69 = arith.constant 0 : index
    %c0_70 = arith.constant 0 : index
    %c0_71 = arith.constant 0 : index
    %c0_72 = arith.constant 0 : index
    %97 = vector.load %arg3[%c0_69, %c0_70, %c0_71, %c0_72] : memref<1x4x256x128xbf16, #tpu.memory_space<vmem>>, vector<1x1x256x128xbf16>
    %98 = vector.shape_cast %97 : vector<1x1x256x128xbf16> to vector<256x128xbf16>
    %99 = vector.shape_cast %96 : vector<256x128xbf16> to vector<1x1x256x128xbf16>
    tpu.vector_store %arg3[%c0_69, %c0_70, %c0_71, %c0_72], %99 {strides = array<i32>} : memref<1x4x256x128xbf16, #tpu.memory_space<vmem>>, vector<1x1x256x128xbf16>,
    %c1_73 = arith.constant 1 : index
    %c0_74 = arith.constant 0 : index
    %c0_75 = arith.constant 0 : index
    %100 = vector.load %arg4[%c1_73, %c0_74, %c0_75] : memref<4x256x128xf32, #tpu.memory_space<vmem>>, vector<1x256x128xf32>
    %101 = vector.shape_cast %100 : vector<1x256x128xf32> to vector<256x128xf32>
    %102 = vector.broadcast %84 : vector<1x128xf32> to vector<256x128xf32>
    %103 = arith.mulf %101, %102 : vector<256x128xf32>
    %104 = vector.broadcast %87 : vector<1x128xf32> to vector<256x128xf32>
    %105 = arith.addf %103, %104 : vector<256x128xf32>
    %cst_76 = arith.constant 0.000000e+00 : f32
    %106 = vector.broadcast %cst_76 : f32 to vector<256x128xf32>
    %107 = arith.maximumf %105, %106 : vector<256x128xf32>
    %108 = arith.truncf %107 : vector<256x128xf32> to vector<256x128xbf16>
    %c0_77 = arith.constant 0 : index
    %c1_78 = arith.constant 1 : index
    %c0_79 = arith.constant 0 : index
    %c0_80 = arith.constant 0 : index
    %109 = vector.load %arg3[%c0_77, %c1_78, %c0_79, %c0_80] : memref<1x4x256x128xbf16, #tpu.memory_space<vmem>>, vector<1x1x256x128xbf16>
    %110 = vector.shape_cast %109 : vector<1x1x256x128xbf16> to vector<256x128xbf16>
    %111 = vector.shape_cast %108 : vector<256x128xbf16> to vector<1x1x256x128xbf16>
    tpu.vector_store %arg3[%c0_77, %c1_78, %c0_79, %c0_80], %111 {strides = array<i32>} : memref<1x4x256x128xbf16, #tpu.memory_space<vmem>>, vector<1x1x256x128xbf16>,
    %c2_81 = arith.constant 2 : index
    %c0_82 = arith.constant 0 : index
    %c0_83 = arith.constant 0 : index
    %112 = vector.load %arg4[%c2_81, %c0_82, %c0_83] : memref<4x256x128xf32, #tpu.memory_space<vmem>>, vector<1x256x128xf32>
    %113 = vector.shape_cast %112 : vector<1x256x128xf32> to vector<256x128xf32>
    %114 = vector.broadcast %84 : vector<1x128xf32> to vector<256x128xf32>
    %115 = arith.mulf %113, %114 : vector<256x128xf32>
    %116 = vector.broadcast %87 : vector<1x128xf32> to vector<256x128xf32>
    %117 = arith.addf %115, %116 : vector<256x128xf32>
    %cst_84 = arith.constant 0.000000e+00 : f32
    %118 = vector.broadcast %cst_84 : f32 to vector<256x128xf32>
    %119 = arith.maximumf %117, %118 : vector<256x128xf32>
    %120 = arith.truncf %119 : vector<256x128xf32> to vector<256x128xbf16>
    %c0_85 = arith.constant 0 : index
    %c2_86 = arith.constant 2 : index
    %c0_87 = arith.constant 0 : index
    %c0_88 = arith.constant 0 : index
    %121 = vector.load %arg3[%c0_85, %c2_86, %c0_87, %c0_88] : memref<1x4x256x128xbf16, #tpu.memory_space<vmem>>, vector<1x1x256x128xbf16>
    %122 = vector.shape_cast %121 : vector<1x1x256x128xbf16> to vector<256x128xbf16>
    %123 = vector.shape_cast %120 : vector<256x128xbf16> to vector<1x1x256x128xbf16>
    tpu.vector_store %arg3[%c0_85, %c2_86, %c0_87, %c0_88], %123 {strides = array<i32>} : memref<1x4x256x128xbf16, #tpu.memory_space<vmem>>, vector<1x1x256x128xbf16>,
    %c3_89 = arith.constant 3 : index
    %c0_90 = arith.constant 0 : index
    %c0_91 = arith.constant 0 : index
    %124 = vector.load %arg4[%c3_89, %c0_90, %c0_91] : memref<4x256x128xf32, #tpu.memory_space<vmem>>, vector<1x256x128xf32>
    %125 = vector.shape_cast %124 : vector<1x256x128xf32> to vector<256x128xf32>
    %126 = vector.broadcast %84 : vector<1x128xf32> to vector<256x128xf32>
    %127 = arith.mulf %125, %126 : vector<256x128xf32>
    %128 = vector.broadcast %87 : vector<1x128xf32> to vector<256x128xf32>
    %129 = arith.addf %127, %128 : vector<256x128xf32>
    %cst_92 = arith.constant 0.000000e+00 : f32
    %130 = vector.broadcast %cst_92 : f32 to vector<256x128xf32>
    %131 = arith.maximumf %129, %130 : vector<256x128xf32>
    %132 = arith.truncf %131 : vector<256x128xf32> to vector<256x128xbf16>
    %c0_93 = arith.constant 0 : index
    %c3_94 = arith.constant 3 : index
    %c0_95 = arith.constant 0 : index
    %c0_96 = arith.constant 0 : index
    %133 = vector.load %arg3[%c0_93, %c3_94, %c0_95, %c0_96] : memref<1x4x256x128xbf16, #tpu.memory_space<vmem>>, vector<1x1x256x128xbf16>
    %134 = vector.shape_cast %133 : vector<1x1x256x128xbf16> to vector<256x128xbf16>
    %135 = vector.shape_cast %132 : vector<256x128xbf16> to vector<1x1x256x128xbf16>
    tpu.vector_store %arg3[%c0_93, %c3_94, %c0_95, %c0_96], %135 {strides = array<i32>} : memref<1x4x256x128xbf16, #tpu.memory_space<vmem>>, vector<1x1x256x128xbf16>,
    return
  }
  func.func @transform_0(%arg0: i32) -> (i32, i32, i32, i32) {
    %c0_i32 = arith.constant 0 : i32
    %c0_i32_0 = arith.constant 0 : i32
    %c0_i32_1 = arith.constant 0 : i32
    %c0_i32_2 = arith.constant 0 : i32
    return %arg0, %c0_i32, %c0_i32_0, %c0_i32_1 : i32, i32, i32, i32
  }
  func.func @transform_1(%arg0: i32) -> (i32, i32, i32) {
    %c0_i32 = arith.constant 0 : i32
    %c0_i32_0 = arith.constant 0 : i32
    %c0_i32_1 = arith.constant 0 : i32
    %c0_i32_2 = arith.constant 0 : i32
    return %c0_i32, %c0_i32_0, %c0_i32_1 : i32, i32, i32
  }
  func.func @transform_2(%arg0: i32) -> (i32, i32, i32, i32) {
    %c0_i32 = arith.constant 0 : i32
    %c0_i32_0 = arith.constant 0 : i32
    %c0_i32_1 = arith.constant 0 : i32
    %c0_i32_2 = arith.constant 0 : i32
    return %arg0, %c0_i32, %c0_i32_0, %c0_i32_1 : i32, i32, i32, i32
  }
}

</mosaic_0001>

<bundles_post_ra>
// kernel: unet_up.1
= control target key start
LH: loop header
LB: loop body
LE: loop exit
PB: predicated region body
PF: predicated region fallthrough
CT: control target
= control target key end

     0   :  { %s4971_s9 = smov 0   ;;  %s6350_s0 = inlined_call_operand.vmem [shape: bf16[2,4,256,128], index: 0, kind: input, shape index: {}]   ;;  %s6351_s1 = inlined_call_operand.vmem [shape: bf16[4,128,128], index: 1, kind: input, shape index: {}]   ;;  %s6352_s2 = inlined_call_operand.vmem [shape: bf16[2,4,256,128], index: 2, kind: output, shape index: {}]  }
   0x1 LB: > { %s3566_s10 = sadd.s32 4294967295, %s4954_s9   ;;  %p3570_p0 = scmp.ge.s32.totalorder %s4954_s9, 1  ;;  %s4954_s9 = sphi %s4971_s9, %s12_s9  }
   0x2   : > { %p112_p1 = scmp.lt.s32.totalorder %s4954_s9, 3 }
   0x4   : > { %p113_p2 = pnand %p3570_p0, %p112_p1 }
   0x6   : > { %116 = sbr.rel (%p113_p2) target bundleno = 686 (0x2ae), region = 28 }
   0xd   : > { %v4850_v0 = vld [vmem:[%s6351_s1] sm:$0xff]   ;;  %v4852_v2 = vld [vmem:[%s6351_s1 + $0x8] sm:$0xff]   ;;  %p134_p3 = scmp.lt.s32.totalorder %s3566_s10, 1  ;;  %v4854_v4 = vld [vmem:[%s6351_s1 + $0x10] sm:$0xff]  }
   0xe   : > { %v4851_v1 = vld [vmem:[%s6351_s1 + $0x40] sm:$0xff]   ;;  %4650 = vmatprep.subr.bf16.mxu0 %v4850_v0  ;;  %v4853_v3 = vld [vmem:[%s6351_s1 + $0x48] sm:$0xff]   ;;  %v4855_v5 = vld [vmem:[%s6351_s1 + $0x50] sm:$0xff]  }
   0xf   : > { %4698 = vmatprep.subr.bf16.mxu1 %v4851_v1  ;;  %4651 = vmatpush3.bf16.msra.mxu0 %v4850_v0  ;;  %s6838_s10 = smov (!%p134_p3, %s3566_s10), 1  ;;  %v4856_v6 = vld [vmem:[%s6351_s1 + $0x18] sm:$0xff]   ;;  %v4858_v8 = vld [vmem:[%s6351_s1 + $0x20] sm:$0xff]   ;;  %v4860_v10 = vld [vmem:[%s6351_s1 + $0x28] sm:$0xff]  }
  0x10   : > { %4699 = vmatpush3.bf16.msra.mxu1 %v4851_v1  ;;  %4652 = vmatprep.subr.bf16.mxu0 %v4852_v2  ;;  %v4857_v7 = vld [vmem:[%s6351_s1 + $0x58] sm:$0xff]   ;;  %s4041_s27 = sshll.u32 %s6838_s10, 9  ;;  %v4859_v9 = vld [vmem:[%s6351_s1 + $0x60] sm:$0xff]   ;;  %v4861_v11 = vld [vmem:[%s6351_s1 + $0x68] sm:$0xff]  }
  0x11   : > { %4700 = vmatprep.subr.bf16.mxu1 %v4853_v3  ;;  %s5017_s6 = scalar_lea.vmem %s6350_s0, %s4041_s27  ;;  %v4862_v14 = vld [vmem:[%s6351_s1 + $0x30] sm:$0xff]   ;;  %v4864_v16 = vld [vmem:[%s6351_s1 + $0x38] sm:$0xff]   ;;  %v4870_v19 = vld [vmem:[%s6351_s1 + $0x80] sm:$0xff]   ;;  %s5948_s3 = scalar_lea.vmem %s6352_s2, %s4041_s27 }
  0x12   : > { %v4866_v12 = vld [vmem:[%s5017_s6] sm:$0xff]   ;;  %v4863_v15 = vld [vmem:[%s6351_s1 + $0x70] sm:$0xff]   ;;  %v4865_v17 = vld [vmem:[%s6351_s1 + $0x78] sm:$0xff]  }
  0x13   : > { %4653 = vmatpush3.bf16.msra.mxu0 %v4852_v2  ;;  %v4867_v13 = vld [vmem:[%s5017_s6 + $0x80] sm:$0xff]   ;;  %4666 = vmatprep.mubr.bf16.mxu0 %v4866_v12  ;;  %v4868_v18 = vld [vmem:[%s5017_s6 + $0x8] sm:$0xff]   ;;  %v4872_v22 = vld [vmem:[%s5017_s6 + $0x10] sm:$0xff]  }
  0x14   : > { %4701 = vmatpush3.bf16.msra.mxu1 %v4853_v3  ;;  %4654 = vmatprep.subr.bf16.mxu0 %v4854_v4  ;;  %v4871_v20 = vld [vmem:[%s6351_s1 + $0xc0] sm:$0xff]   ;;  %v4869_v21 = vld [vmem:[%s5017_s6 + $0x88] sm:$0xff]   ;;  %v4873_v23 = vld [vmem:[%s5017_s6 + $0x90] sm:$0xff]  }
  0x15   : > { %4702 = vmatprep.subr.bf16.mxu1 %v4855_v5  ;;  %4714 = vmatprep.mubr.bf16.mxu1 %v4867_v13  ;;  %v4876_v24 = vld [vmem:[%s6351_s1 + $0x88] sm:$0xff]   ;;  %v4874_v26 = vld [vmem:[%s5017_s6 + $0x18] sm:$0xff]   ;;  %v4882_v27 = vld [vmem:[%s6351_s1 + $0x90] sm:$0xff]  }
  0x16   : > { %v4877_v25 = vld [vmem:[%s6351_s1 + $0xc8] sm:$0xff]   ;;  %v4883_v28 = vld [vmem:[%s6351_s1 + $0xd0] sm:$0xff]   ;;  %v4875_v29 = vld [vmem:[%s5017_s6 + $0x98] sm:$0xff]  }
  0x17   : > { %4655 = vmatpush3.bf16.msra.mxu0 %v4854_v4  ;;  %v4878_v30 = vld [vmem:[%s5017_s6 + $0x20] sm:$0xff]   ;;  %v4888_v32 = vld [vmem:[%s6351_s1 + $0x98] sm:$0xff]   ;;  %v4880_v34 = vld [vmem:[%s5017_s6 + $0x28] sm:$0xff]  }
  0x18   : > { %4703 = vmatpush3.bf16.msra.mxu1 %v4855_v5  ;;  %4656 = vmatprep.subr.bf16.mxu0 %v4856_v6  ;;  %v4879_v31 = vld [vmem:[%s5017_s6 + $0xa0] sm:$0xff]   ;;  %v4889_v33 = vld [vmem:[%s6351_s1 + $0xd8] sm:$0xff]   ;;  %v4881_v35 = vld [vmem:[%s5017_s6 + $0xa8] sm:$0xff]  }
  0x19   : > { %4704 = vmatprep.subr.bf16.mxu1 %v4857_v7  ;;  %v4894_v36 = vld [vmem:[%s6351_s1 + $0xa0] sm:$0xff]   ;;  %v4884_v38 = vld [vmem:[%s5017_s6 + $0x30] sm:$0xff]   ;;  %v4900_v40 = vld [vmem:[%s6351_s1 + $0xa8] sm:$0xff]  }
  0x1a   : > { %v4895_v37 = vld [vmem:[%s6351_s1 + $0xe0] sm:$0xff]   ;;  %v4885_v39 = vld [vmem:[%s5017_s6 + $0xb0] sm:$0xff]   ;;  %v4901_v41 = vld [vmem:[%s6351_s1 + $0xe8] sm:$0xff]  }
  0x1b   : > { %4657 = vmatpush3.bf16.msra.mxu0 %v4856_v6  ;;  %v4886_v42 = vld [vmem:[%s5017_s6 + $0x38] sm:$0xff]   ;;  %v4890_v44 = vld [vmem:[%s5017_s6 + $0x40] sm:$0xff]   ;;  %v4906_v46 = vld [vmem:[%s6351_s1 + $0xb0] sm:$0xff]  }
  0x1c   : > { %4705 = vmatpush3.bf16.msra.mxu1 %v4857_v7  ;;  %4658 = vmatprep.subr.bf16.mxu0 %v4858_v8  ;;  %v4887_v43 = vld [vmem:[%s5017_s6 + $0xb8] sm:$0xff]   ;;  %v4891_v45 = vld [vmem:[%s5017_s6 + $0xc0] sm:$0xff]   ;;  %v4907_v47 = vld [vmem:[%s6351_s1 + $0xf0] sm:$0xff]  }
  0x1d   : > { %4706 = vmatprep.subr.bf16.mxu1 %v4859_v9  ;;  %v4892_v48 = vld [vmem:[%s5017_s6 + $0x48] sm:$0xff]   ;;  %v4896_v50 = vld [vmem:[%s5017_s6 + $0x50] sm:$0xff]   ;;  %v4912_v51 = vld [vmem:[%s6351_s1 + $0xb8] sm:$0xff]  }
  0x1e   : > { %v4893_v49 = vld [vmem:[%s5017_s6 + $0xc8] sm:$0xff]   ;;  %v4913_v52 = vld [vmem:[%s6351_s1 + $0xf8] sm:$0xff]   ;;  %v4897_v53 = vld [vmem:[%s5017_s6 + $0xd0] sm:$0xff]  }
  0x1f   : > { %4659 = vmatpush3.bf16.msra.mxu0 %v4858_v8  ;;  %v4898_v54 = vld [vmem:[%s5017_s6 + $0x58] sm:$0xff]   ;;  %v4902_v56 = vld [vmem:[%s5017_s6 + $0x60] sm:$0xff]   ;;  %v4904_v58 = vld [vmem:[%s5017_s6 + $0x68] sm:$0xff]  }
  0x20   : > { %4707 = vmatpush3.bf16.msra.mxu1 %v4859_v9  ;;  %4660 = vmatprep.subr.bf16.mxu0 %v4860_v10  ;;  %v4899_v55 = vld [vmem:[%s5017_s6 + $0xd8] sm:$0xff]   ;;  %v4903_v57 = vld [vmem:[%s5017_s6 + $0xe0] sm:$0xff]   ;;  %v4905_v59 = vld [vmem:[%s5017_s6 + $0xe8] sm:$0xff]  }
  0x21   : > { %4708 = vmatprep.subr.bf16.mxu1 %v4861_v11  ;;  %v4908_v60 = vld [vmem:[%s5017_s6 + $0x70] sm:$0xff]   ;;  %v4910_v62 = vld [vmem:[%s5017_s6 + $0x78] sm:$0xff]   ;;  %v4914_v0 = vld [vmem:[%s5017_s6 + $0x100] sm:$0xff]  }
  0x22   : > { %v4909_v61 = vld [vmem:[%s5017_s6 + $0xf0] sm:$0xff]   ;;  %v4911_v63 = vld [vmem:[%s5017_s6 + $0xf8] sm:$0xff]   ;;  %v4915_v1 = vld [vmem:[%s5017_s6 + $0x180] sm:$0xff]  }
  0x23   : > { %4661 = vmatpush3.bf16.msra.mxu0 %v4860_v10  ;;  %v4916_v2 = vld [vmem:[%s5017_s6 + $0x108] sm:$0xff]   ;;  %v4918_v4 = vld [vmem:[%s5017_s6 + $0x110] sm:$0xff]   ;;  %v4920_v6 = vld [vmem:[%s5017_s6 + $0x118] sm:$0xff]  }
  0x24   : > { %4709 = vmatpush3.bf16.msra.mxu1 %v4861_v11  ;;  %4662 = vmatprep.subr.bf16.mxu0 %v4862_v14  ;;  %v4917_v3 = vld [vmem:[%s5017_s6 + $0x188] sm:$0xff]   ;;  %v4919_v5 = vld [vmem:[%s5017_s6 + $0x190] sm:$0xff]   ;;  %v4921_v7 = vld [vmem:[%s5017_s6 + $0x198] sm:$0xff]  }
  0x25   : > { %4710 = vmatprep.subr.bf16.mxu1 %v4863_v15  ;;  %v4922_v8 = vld [vmem:[%s5017_s6 + $0x120] sm:$0xff]   ;;  %v4924_v10 = vld [vmem:[%s5017_s6 + $0x128] sm:$0xff]   ;;  %v4926_v12 = vld [vmem:[%s5017_s6 + $0x130] sm:$0xff]  }
  0x26   : > { %v4923_v9 = vld [vmem:[%s5017_s6 + $0x1a0] sm:$0xff]   ;;  %v4925_v11 = vld [vmem:[%s5017_s6 + $0x1a8] sm:$0xff]   ;;  %v4927_v13 = vld [vmem:[%s5017_s6 + $0x1b0] sm:$0xff]  }
  0x27   : > { %4663 = vmatpush3.bf16.msra.mxu0 %v4862_v14  ;;  %v4928_v14 = vld [vmem:[%s5017_s6 + $0x138] sm:$0xff]  }
  0x28   : > { %4711 = vmatpush3.bf16.msra.mxu1 %v4863_v15  ;;  %4664 = vmatprep.subr.bf16.mxu0 %v4864_v16  ;;  %v4929_v15 = vld [vmem:[%s5017_s6 + $0x1b8] sm:$0xff]  }
  0x29   : > { %4712 = vmatprep.subr.bf16.mxu1 %v4865_v17 }
  0x2b   : > { %4665 = vmatpush3.bf16.msra.mxu0 %v4864_v16  ;;  %v4930_v16 = vld [vmem:[%s5017_s6 + $0x140] sm:$0xff]  }
  0x2c   : > { %4713 = vmatpush3.bf16.msra.mxu1 %v4865_v17  ;;  %4746 = vmatprep.subr.bf16.mxu0 %v4870_v19  ;;  %v4931_v17 = vld [vmem:[%s5017_s6 + $0x1c0] sm:$0xff]  }
  0x2d   : > { %4794 = vmatprep.subr.bf16.mxu1 %v4871_v20 }
  0x2e   : > { %4667 = vmatmul.mubr.bf16.vlgmr.msra.gmra.mrb[0].mxu0 %v4868_v18  ;;  %v4932_v18 = vld [vmem:[%s5017_s6 + $0x148] sm:$0xff]  }
  0x2f   : > { %4715 = vmatmul.mubr.bf16.vlgmr.msra.gmra.mrb[0].mxu1 %v4869_v21  ;;  %4747 = vmatpush3.bf16.msra.mxu0 %v4870_v19  ;;  %v4933_v19 = vld [vmem:[%s5017_s6 + $0x1c8] sm:$0xff]   ;;  %v4935_v21 = vld [vmem:[%s5017_s6 + $0x1d0] sm:$0xff]  }
  0x30   : > { %4795 = vmatpush3.bf16.msra.mxu1 %v4871_v20  ;;  %4670 = vmatprep.mubr.bf16.mxu0 %v4872_v22  ;;  %v4934_v20 = vld [vmem:[%s5017_s6 + $0x150] sm:$0xff]   ;;  %v4936_v22 = vld [vmem:[%s5017_s6 + $0x158] sm:$0xff]  }
  0x31   : > { %4718 = vmatprep.mubr.bf16.mxu1 %v4873_v23  ;;  %4748 = vmatprep.subr.bf16.mxu0 %v4876_v24  ;;  %v4937_v23 = vld [vmem:[%s5017_s6 + $0x1d8] sm:$0xff]  }
  0x32   : > { %4796 = vmatprep.subr.bf16.mxu1 %v4877_v25 }
  0x33   : > { %4749 = vmatpush3.bf16.msra.mxu0 %v4876_v24  ;;  %v4938_v24 = vld [vmem:[%s5017_s6 + $0x160] sm:$0xff]  }
  0x34   : > { %4797 = vmatpush3.bf16.msra.mxu1 %v4877_v25  ;;  %4750 = vmatprep.subr.bf16.mxu0 %v4882_v27  ;;  %v4939_v25 = vld [vmem:[%s5017_s6 + $0x1e0] sm:$0xff]  }
  0x35   : > { %4798 = vmatprep.subr.bf16.mxu1 %v4883_v28 }
  0x36   : > { %4671 = vmatmul.mubr.bf16.gmra.mrb[4].mxu0 %v4874_v26  ;;  %v4940_v26 = vld [vmem:[%s5017_s6 + $0x168] sm:$0xff]  }
  0x37   : > { %4719 = vmatmul.mubr.bf16.gmra.mrb[4].mxu1 %v4875_v29  ;;  %4674 = vmatprep.mubr.bf16.mxu0 %v4878_v30  ;;  %v4943_v29 = vld [vmem:[%s5017_s6 + $0x1f0] sm:$0xff]   ;;  %v4944_v30 = vld [vmem:[%s5017_s6 + $0x178] sm:$0xff]  }
  0x38   : > { %4722 = vmatprep.mubr.bf16.mxu1 %v4879_v31  ;;  %4751 = vmatpush3.bf16.msra.mxu0 %v4882_v27  ;;  %v4941_v27 = vld [vmem:[%s5017_s6 + $0x1e8] sm:$0xff]   ;;  %v4945_v31 = vld [vmem:[%s5017_s6 + $0x1f8] sm:$0xff]  }
  0x39   : > { %4799 = vmatpush3.bf16.msra.mxu1 %v4883_v28  ;;  %4752 = vmatprep.subr.bf16.mxu0 %v4888_v32  ;;  %v4942_v28 = vld [vmem:[%s5017_s6 + $0x170] sm:$0xff]  }
  0x3a   : > { %4800 = vmatprep.subr.bf16.mxu1 %v4889_v33 }
  0x3c   : > { %4753 = vmatpush3.bf16.msra.mxu0 %v4888_v32 }
  0x3d   : > { %4801 = vmatpush3.bf16.msra.mxu1 %v4889_v33  ;;  %4754 = vmatprep.subr.bf16.mxu0 %v4894_v36 }
  0x3e   : > { %4675 = vmatmul.mubr.bf16.gmra.mrb[8].mxu0 %v4880_v34  ;;  %4802 = vmatprep.subr.bf16.mxu1 %v4895_v37 }
  0x3f   : > { %4723 = vmatmul.mubr.bf16.gmra.mrb[8].mxu1 %v4881_v35  ;;  %4678 = vmatprep.mubr.bf16.mxu0 %v4884_v38 }
  0x40   : > { %4726 = vmatprep.mubr.bf16.mxu1 %v4885_v39  ;;  %4755 = vmatpush3.bf16.msra.mxu0 %v4894_v36 }
  0x41   : > { %4803 = vmatpush3.bf16.msra.mxu1 %v4895_v37  ;;  %4756 = vmatprep.subr.bf16.mxu0 %v4900_v40 }
  0x42   : > { %4804 = vmatprep.subr.bf16.mxu1 %v4901_v41 }
  0x44   : > { %4757 = vmatpush3.bf16.msra.mxu0 %v4900_v40 }
  0x45   : > { %4805 = vmatpush3.bf16.msra.mxu1 %v4901_v41  ;;  %4758 = vmatprep.subr.bf16.mxu0 %v4906_v46 }
  0x46   : > { %4679 = vmatmul.mubr.bf16.gmra.mrb[12].mxu0 %v4886_v42  ;;  %4806 = vmatprep.subr.bf16.mxu1 %v4907_v47 }
  0x47   : > { %4727 = vmatmul.mubr.bf16.gmra.mrb[12].mxu1 %v4887_v43  ;;  %4682 = vmatprep.mubr.bf16.mxu0 %v4890_v44 }
  0x48   : > { %4730 = vmatprep.mubr.bf16.mxu1 %v4891_v45  ;;  %4759 = vmatpush3.bf16.msra.mxu0 %v4906_v46 }
  0x49   : > { %4807 = vmatpush3.bf16.msra.mxu1 %v4907_v47  ;;  %4760 = vmatprep.subr.bf16.mxu0 %v4912_v51 }
  0x4a   : > { %4808 = vmatprep.subr.bf16.mxu1 %v4913_v52 }
  0x4c   : > { %4761 = vmatpush3.bf16.msra.mxu0 %v4912_v51 }
  0x4d   : > { %4809 = vmatpush3.bf16.msra.mxu1 %v4913_v52 }
  0x4e   : > { %4683 = vmatmul.mubr.bf16.gmra.mrb[16].mxu0 %v4892_v48 }
  0x4f   : > { %4731 = vmatmul.mubr.bf16.gmra.mrb[16].mxu1 %v4893_v49  ;;  %4686 = vmatprep.mubr.bf16.mxu0 %v4896_v50 }
  0x50   : > { %4734 = vmatprep.mubr.bf16.mxu1 %v4897_v53 }
  0x56   : > { %4687 = vmatmul.mubr.bf16.gmra.mrb[20].mxu0 %v4898_v54 }
  0x57   : > { %4735 = vmatmul.mubr.bf16.gmra.mrb[20].mxu1 %v4899_v55  ;;  %4690 = vmatprep.mubr.bf16.mxu0 %v4902_v56 }
  0x58   : > { %4738 = vmatprep.mubr.bf16.mxu1 %v4903_v57 }
  0x5e   : > { %4691 = vmatmul.mubr.bf16.gmra.mrb[24].mxu0 %v4904_v58 }
  0x5f   : > { %4739 = vmatmul.mubr.bf16.gmra.mrb[24].mxu1 %v4905_v59  ;;  %4694 = vmatprep.mubr.bf16.mxu0 %v4908_v60 }
  0x60   : > { %4742 = vmatprep.mubr.bf16.mxu1 %v4909_v61 }
  0x66   : > { %4695 = vmatmul.mubr.bf16.gmra.mrb[28].mxu0 %v4910_v62 }
  0x67   : > { %4743 = vmatmul.mubr.bf16.gmra.mrb[28].mxu1 %v4911_v63  ;;  %4762 = vmatprep.mubr.bf16.mxu0 %v4914_v0 }
  0x68   : > { %4810 = vmatprep.mubr.bf16.mxu1 %v4915_v1 }
  0x6e   : > { %4763 = vmatmul.mubr.bf16.vlgmr.msra.gmra.mrb[32].mxu0 %v4916_v2 }
  0x6f   : > { %4811 = vmatmul.mubr.bf16.vlgmr.msra.gmra.mrb[32].mxu1 %v4917_v3  ;;  %4766 = vmatprep.mubr.bf16.mxu0 %v4918_v4 }
  0x70   : > { %4814 = vmatprep.mubr.bf16.mxu1 %v4919_v5 }
  0x76   : > { %4767 = vmatmul.mubr.bf16.gmra.mrb[36].mxu0 %v4920_v6 }
  0x77   : > { %4815 = vmatmul.mubr.bf16.gmra.mrb[36].mxu1 %v4921_v7  ;;  %4770 = vmatprep.mubr.bf16.mxu0 %v4922_v8 }
  0x78   : > { %4818 = vmatprep.mubr.bf16.mxu1 %v4923_v9 }
  0x7e   : > { %4771 = vmatmul.mubr.bf16.gmra.mrb[40].mxu0 %v4924_v10 }
  0x7f   : > { %4819 = vmatmul.mubr.bf16.gmra.mrb[40].mxu1 %v4925_v11  ;;  %4774 = vmatprep.mubr.bf16.mxu0 %v4926_v12 }
  0x80   : > { %4822 = vmatprep.mubr.bf16.mxu1 %v4927_v13 }
  0x86   : > { %4775 = vmatmul.mubr.bf16.gmra.mrb[44].mxu0 %v4928_v14 }
  0x87   : > { %4823 = vmatmul.mubr.bf16.gmra.mrb[44].mxu1 %v4929_v15  ;;  %4778 = vmatprep.mubr.bf16.mxu0 %v4930_v16 }
  0x88   : > { %4826 = vmatprep.mubr.bf16.mxu1 %v4931_v17 }
  0x8e   : > { %4779 = vmatmul.mubr.bf16.gmra.mrb[48].mxu0 %v4932_v18 }
  0x8f   : > { %4827 = vmatmul.mubr.bf16.gmra.mrb[48].mxu1 %v4933_v19  ;;  %4782 = vmatprep.mubr.bf16.mxu0 %v4934_v20 }
  0x90   : > { %4830 = vmatprep.mubr.bf16.mxu1 %v4935_v21 }
  0x96   : > { %4783 = vmatmul.mubr.bf16.gmra.mrb[52].mxu0 %v4936_v22 }
  0x97   : > { %4831 = vmatmul.mubr.bf16.gmra.mrb[52].mxu1 %v4937_v23  ;;  %4786 = vmatprep.mubr.bf16.mxu0 %v4938_v24 }
  0x98   : > { %4834 = vmatprep.mubr.bf16.mxu1 %v4939_v25 }
  0x9e   : > { %4787 = vmatmul.mubr.bf16.gmra.mrb[56].mxu0 %v4940_v26 }
  0x9f   : > { %4835 = vmatmul.mubr.bf16.gmra.mrb[56].mxu1 %v4941_v27  ;;  %4790 = vmatprep.mubr.bf16.mxu0 %v4942_v28 }
  0xa0   : > { %4838 = vmatprep.mubr.bf16.mxu1 %v4943_v29 }
  0xa6   : > { %4791 = vmatmul.mubr.bf16.gmra.mrb[60].mxu0 %v4944_v30 }
  0xa7   : > { %4839 = vmatmul.mubr.bf16.gmra.mrb[60].mxu1 %v4945_v31 }
 0x101   : > { %v5149_v32 = vpop.f32.mrb[0].mxu0 }
 0x102   : > { %v5151_v33 = vpop.f32.mrb[0].mxu1  ;;  %v5153_v34 = vpop.f32.mrb[1].mxu0 }
 0x103   : > { %6546 = vst [vmem:[#allocation3_spill] sm:$0xff] %v5151_v33  ;;  %v5155_v35 = vpop.f32.mrb[1].mxu1  ;;  %v5157_v36 = vpop.f32.mrb[2].mxu0 }
 0x104   : > { %6547 = vst [vmem:[#allocation4_spill] sm:$0xff] %v5155_v35  ;;  %v5159_v37 = vpop.f32.mrb[2].mxu1  ;;  %v5161_v38 = vpop.f32.mrb[3].mxu0 }
 0x105   : > { %6548 = vst [vmem:[#allocation5_spill] sm:$0xff] %v5159_v37  ;;  %v530_v39 = vadd.f32 %v5161_v38, %v5153_v34  ;;  %v5165_v40 = vpop.f32.mrb[3].mxu1 }
 0x106   : > { %6549 = vst [vmem:[#allocation6_spill] sm:$0xff] %v5165_v40  ;;  %v956_v41 = vadd.f32 %v5165_v40, %v5155_v35 }
 0x107   : > { %v531_v42 = vadd.f32 %v5149_v32, %v530_v39 }
 0x108   : > { %v957_v43 = vadd.f32 %v5151_v33, %v956_v41 }
 0x109   : > { %v5171_v44 = vpop.f32.mrb[4].mxu0  ;;  %v532_v45 = vadd.f32 %v5157_v36, %v531_v42 }
 0x10a   : > { %v5174_v46 = vpop.f32.mrb[4].mxu1  ;;  %v5176_v47 = vpop.f32.mrb[5].mxu0  ;;  %v958_v48 = vadd.f32 %v5159_v37, %v957_v43 }
 0x10b   : > { %6550 = vst [vmem:[#allocation7_spill] sm:$0xff] %v5174_v46  ;;  %v533_v49 = vadd.f32 %v532_v45, %v5176_v47  ;;  %v5180_v50 = vpop.f32.mrb[5].mxu1  ;;  %v5182_v51 = vpop.f32.mrb[6].mxu0 }
 0x10c   : > { %6551 = vst [vmem:[#allocation8_spill] sm:$0xff] %v5180_v50  ;;  %v959_v52 = vadd.f32 %v958_v48, %v5180_v50  ;;  %v5185_v53 = vpop.f32.mrb[6].mxu1  ;;  %v5187_v54 = vpop.f32.mrb[7].mxu0 }
 0x10d   : > { %6552 = vst [vmem:[#allocation9_spill] sm:$0xff] %v5185_v53  ;;  %v534_v55 = vadd.f32 %v533_v49, %v5187_v54  ;;  %v5190_v56 = vpop.f32.mrb[7].mxu1 }
 0x10e   : > { %6553 = vst [vmem:[#allocation10_spill] sm:$0xff] %v5190_v56  ;;  %v960_v57 = vadd.f32 %v959_v52, %v5190_v56 }
 0x10f   : > { %v535_v58 = vadd.f32 %v5171_v44, %v534_v55 }
 0x110   : > { %v961_v59 = vadd.f32 %v5174_v46, %v960_v57 }
 0x111   : > { %v5195_v60 = vpop.f32.mrb[8].mxu0  ;;  %v536_v61 = vadd.f32 %v5182_v51, %v535_v58 }
 0x112   : > { %v5198_v62 = vpop.f32.mrb[8].mxu1  ;;  %v5200_v63 = vpop.f32.mrb[9].mxu0  ;;  %v962_v0 = vadd.f32 %v5185_v53, %v961_v59 }
 0x113   : > { %6554 = vst [vmem:[#allocation11_spill] sm:$0xff] %v5198_v62  ;;  %v537_v1 = vadd.f32 %v536_v61, %v5200_v63  ;;  %v5204_v2 = vpop.f32.mrb[9].mxu1  ;;  %v5206_v3 = vpop.f32.mrb[10].mxu0 }
 0x114   : > { %6555 = vst [vmem:[#allocation12_spill] sm:$0xff] %v5204_v2  ;;  %v963_v4 = vadd.f32 %v962_v0, %v5204_v2  ;;  %v5209_v5 = vpop.f32.mrb[10].mxu1  ;;  %v5211_v6 = vpop.f32.mrb[11].mxu0 }
 0x115   : > { %6556 = vst [vmem:[#allocation13_spill] sm:$0xff] %v5209_v5  ;;  %v538_v7 = vadd.f32 %v537_v1, %v5211_v6  ;;  %v5214_v8 = vpop.f32.mrb[11].mxu1 }
 0x116   : > { %6557 = vst [vmem:[#allocation14_spill] sm:$0xff] %v5214_v8  ;;  %v964_v9 = vadd.f32 %v963_v4, %v5214_v8 }
 0x117   : > { %v539_v10 = vadd.f32 %v5195_v60, %v538_v7 }
 0x118   : > { %v965_v11 = vadd.f32 %v5198_v62, %v964_v9 }
 0x119   : > { %v5219_v12 = vpop.f32.mrb[12].mxu0  ;;  %v540_v13 = vadd.f32 %v5206_v3, %v539_v10 }
 0x11a   : > { %v5222_v14 = vpop.f32.mrb[12].mxu1  ;;  %v5224_v15 = vpop.f32.mrb[13].mxu0  ;;  %v966_v16 = vadd.f32 %v5209_v5, %v965_v11 }
 0x11b   : > { %6558 = vst [vmem:[#allocation15_spill] sm:$0xff] %v5222_v14  ;;  %v541_v17 = vadd.f32 %v540_v13, %v5224_v15  ;;  %v5228_v18 = vpop.f32.mrb[13].mxu1  ;;  %v5230_v19 = vpop.f32.mrb[14].mxu0 }
 0x11c   : > { %6559 = vst [vmem:[#allocation16_spill] sm:$0xff] %v5228_v18  ;;  %v967_v20 = vadd.f32 %v966_v16, %v5228_v18  ;;  %v5233_v21 = vpop.f32.mrb[14].mxu1  ;;  %v5235_v22 = vpop.f32.mrb[15].mxu0 }
 0x11d   : > { %6560 = vst [vmem:[#allocation17_spill] sm:$0xff] %v5233_v21  ;;  %v542_v23 = vadd.f32 %v541_v17, %v5235_v22  ;;  %v5238_v24 = vpop.f32.mrb[15].mxu1 }
 0x11e   : > { %6561 = vst [vmem:[#allocation18_spill] sm:$0xff] %v5238_v24  ;;  %v968_v25 = vadd.f32 %v967_v20, %v5238_v24 }
 0x11f   : > { %v543_v26 = vadd.f32 %v5219_v12, %v542_v23 }
 0x120   : > { %v969_v27 = vadd.f32 %v5222_v14, %v968_v25 }
 0x121   : > { %v5243_v28 = vpop.f32.mrb[16].mxu0  ;;  %v544_v29 = vadd.f32 %v5230_v19, %v543_v26 }
 0x122   : > { %v5246_v30 = vpop.f32.mrb[16].mxu1  ;;  %v5248_v31 = vpop.f32.mrb[17].mxu0  ;;  %v970_v39 = vadd.f32 %v5233_v21, %v969_v27 }
 0x123   : > { %6562 = vst [vmem:[#allocation19_spill] sm:$0xff] %v5246_v30  ;;  %v545_v41 = vadd.f32 %v544_v29, %v5248_v31  ;;  %v5252_v42 = vpop.f32.mrb[17].mxu1  ;;  %v5254_v43 = vpop.f32.mrb[18].mxu0 }
 0x124   : > { %6563 = vst [vmem:[#allocation20_spill] sm:$0xff] %v5252_v42  ;;  %6564 = vst [vmem:[#allocation21_spill] sm:$0xff] %v5254_v43  ;;  %v971_v45 = vadd.f32 %v970_v39, %v5252_v42  ;;  %v5257_v48 = vpop.f32.mrb[18].mxu1  ;;  %v5259_v49 = vpop.f32.mrb[19].mxu0 }
 0x125   : > { %6565 = vst [vmem:[#allocation22_spill] sm:$0xff] %v5257_v48  ;;  %v546_v52 = vadd.f32 %v545_v41, %v5259_v49  ;;  %v5262_v55 = vpop.f32.mrb[19].mxu1 }
 0x126   : > { %6566 = vst [vmem:[#allocation23_spill] sm:$0xff] %v5262_v55  ;;  %v972_v57 = vadd.f32 %v971_v45, %v5262_v55 }
 0x127   : > { %v547_v58 = vadd.f32 %v5243_v28, %v546_v52 }
 0x128   : > { %v973_v59 = vadd.f32 %v5246_v30, %v972_v57 }
 0x129   : > { %v5267_v61 = vpop.f32.mrb[20].mxu0  ;;  %v548_v0 = vadd.f32 %v5254_v43, %v547_v58 }
 0x12a   : > { %6567 = vst [vmem:[#allocation24_spill] sm:$0xff] %v5267_v61  ;;  %v5270_v1 = vpop.f32.mrb[20].mxu1  ;;  %v5272_v4 = vpop.f32.mrb[21].mxu0  ;;  %v974_v7 = vadd.f32 %v5257_v48, %v973_v59 }
 0x12b   : > { %6568 = vst [vmem:[#allocation25_spill] sm:$0xff] %v5270_v1  ;;  %6569 = vst [vmem:[#allocation26_spill] sm:$0xff] %v5272_v4  ;;  %v549_v9 = vadd.f32 %v548_v0, %v5272_v4  ;;  %v5276_v10 = vpop.f32.mrb[21].mxu1  ;;  %v5278_v11 = vpop.f32.mrb[22].mxu0 }
 0x12c   : > { %6570 = vst [vmem:[#allocation27_spill] sm:$0xff] %v5276_v10  ;;  %6571 = vst [vmem:[#allocation28_spill] sm:$0xff] %v5278_v11  ;;  %v975_v13 = vadd.f32 %v974_v7, %v5276_v10  ;;  %v5281_v16 = vpop.f32.mrb[22].mxu1  ;;  %v5283_v17 = vpop.f32.mrb[23].mxu0 }
 0x12d   : > { %6572 = vst [vmem:[#allocation29_spill] sm:$0xff] %v5281_v16  ;;  %6573 = vst [vmem:[#allocation30_spill] sm:$0xff] %v5283_v17  ;;  %v550_v20 = vadd.f32 %v549_v9, %v5283_v17  ;;  %v5286_v23 = vpop.f32.mrb[23].mxu1 }
 0x12e   : > { %6574 = vst [vmem:[#allocation31_spill] sm:$0xff] %v5286_v23  ;;  %v976_v25 = vadd.f32 %v975_v13, %v5286_v23 }
 0x12f   : > { %v551_v26 = vadd.f32 %v5267_v61, %v550_v20 }
 0x130   : > { %v977_v27 = vadd.f32 %v5270_v1, %v976_v25 }
 0x131   : > { %v5291_v29 = vpop.f32.mrb[24].mxu0  ;;  %v552_v39 = vadd.f32 %v5278_v11, %v551_v26 }
 0x132   : > { %6575 = vst [vmem:[#allocation32_spill] sm:$0xff] %v5291_v29  ;;  %v5294_v41 = vpop.f32.mrb[24].mxu1  ;;  %v5296_v45 = vpop.f32.mrb[25].mxu0  ;;  %v978_v52 = vadd.f32 %v5281_v16, %v977_v27 }
 0x133   : > { %6576 = vst [vmem:[#allocation33_spill] sm:$0xff] %v5294_v41  ;;  %6577 = vst [vmem:[#allocation34_spill] sm:$0xff] %v5296_v45  ;;  %v553_v57 = vadd.f32 %v552_v39, %v5296_v45  ;;  %v5300_v58 = vpop.f32.mrb[25].mxu1  ;;  %v5302_v59 = vpop.f32.mrb[26].mxu0 }
 0x134   : > { %6578 = vst [vmem:[#allocation35_spill] sm:$0xff] %v5300_v58  ;;  %6579 = vst [vmem:[#allocation36_spill] sm:$0xff] %v5302_v59  ;;  %v979_v0 = vadd.f32 %v978_v52, %v5300_v58  ;;  %v5305_v7 = vpop.f32.mrb[26].mxu1  ;;  %v5307_v9 = vpop.f32.mrb[27].mxu0 }
 0x135   : > { %6580 = vst [vmem:[#allocation37_spill] sm:$0xff] %v5305_v7  ;;  %6581 = vst [vmem:[#allocation38_spill] sm:$0xff] %v5307_v9  ;;  %v554_v13 = vadd.f32 %v553_v57, %v5307_v9  ;;  %v5310_v20 = vpop.f32.mrb[27].mxu1 }
 0x136   : > { %6582 = vst [vmem:[#allocation39_spill] sm:$0xff] %v5310_v20  ;;  %v980_v25 = vadd.f32 %v979_v0, %v5310_v20 }
 0x137   : > { %v555_v26 = vadd.f32 %v5291_v29, %v554_v13 }
 0x138   : > { %v981_v27 = vadd.f32 %v5294_v41, %v980_v25 }
 0x139   : > { %v5315_v39 = vpop.f32.mrb[28].mxu0  ;;  %v556_v16 = vadd.f32 %v5302_v59, %v555_v26 }
 0x13a   : > { %6583 = vst [vmem:[#allocation40_spill] sm:$0xff] %v5315_v39  ;;  %v5318_v1 = vpop.f32.mrb[28].mxu1  ;;  %v5320_v52 = vpop.f32.mrb[29].mxu0  ;;  %v982_v58 = vadd.f32 %v5305_v7, %v981_v27 }
 0x13b   : > { %6584 = vst [vmem:[#allocation41_spill] sm:$0xff] %v5318_v1  ;;  %6585 = vst [vmem:[#allocation42_spill] sm:$0xff] %v5320_v52  ;;  %v557_v57 = vadd.f32 %v556_v16, %v5320_v52  ;;  %v5324_v23 = vpop.f32.mrb[29].mxu1  ;;  %v5326_v10 = vpop.f32.mrb[30].mxu0 }
 0x13c   : > { %6586 = vst [vmem:[#allocation43_spill] sm:$0xff] %v5324_v23  ;;  %6587 = vst [vmem:[#allocation44_spill] sm:$0xff] %v5326_v10  ;;  %v983_v0 = vadd.f32 %v982_v58, %v5324_v23  ;;  %v5329_v13 = vpop.f32.mrb[30].mxu1  ;;  %v5331_v25 = vpop.f32.mrb[31].mxu0 }
 0x13d   : > { %6588 = vst [vmem:[#allocation45_spill] sm:$0xff] %v5329_v13  ;;  %6589 = vst [vmem:[#allocation46_spill] sm:$0xff] %v5331_v25  ;;  %v558_v26 = vadd.f32 %v557_v57, %v5331_v25  ;;  %v5334_v41 = vpop.f32.mrb[31].mxu1 }
 0x13e   : > { %6590 = vst [vmem:[#allocation47_spill] sm:$0xff] %v5334_v41  ;;  %v984_v20 = vadd.f32 %v983_v0, %v5334_v41 }
 0x13f   : > { %v559_v27 = vadd.f32 %v5315_v39, %v558_v26 }
 0x140   : > { %v985_v16 = vadd.f32 %v5318_v1, %v984_v20 }
 0x141   : > { %v560_v7 = vadd.f32 %v5326_v10, %v559_v27  ;;  %v5340_v48 = vpop.f32.mrb[32].mxu0 }
 0x142   : > { %6591 = vst [vmem:[#allocation48_spill] sm:$0xff] %v5340_v48  ;;  %v986_v58 = vadd.f32 %v5329_v13, %v985_v16  ;;  %v5343_v23 = vpop.f32.mrb[32].mxu1  ;;  %v5345_v30 = vpop.f32.mrb[33].mxu0 }
 0x143   : > { %6592 = vst [vmem:[#allocation49_spill] sm:$0xff] %v5343_v23  ;;  %6593 = vst [vmem:[#allocation50_spill] sm:$0xff] %v5345_v30  ;;  %v561_v55 = vrot.slane %v560_v7, 4  ;;  %v5347_v57 = vpop.f32.mrb[33].mxu1  ;;  %v5349_v42 = vpop.f32.mrb[34].mxu0 }
 0x144   : > { %6594 = vst [vmem:[#allocation51_spill] sm:$0xff] %v5347_v57  ;;  %6595 = vst [vmem:[#allocation52_spill] sm:$0xff] %v5349_v42  ;;  %v987_v0 = vrot.slane %v986_v58, 4  ;;  %v5351_v41 = vpop.f32.mrb[34].mxu1  ;;  %v5353_v26 = vpop.f32.mrb[35].mxu0 }
 0x145   : > { %6596 = vst [vmem:[#allocation53_spill] sm:$0xff] %v5351_v41  ;;  %6597 = vst [vmem:[#allocation54_spill] sm:$0xff] %v5353_v26  ;;  %v562_v20 = vadd.f32 %v561_v55, %v560_v7  ;;  %v1382_v27 = vadd.f32 %v5353_v26, %v5345_v30  ;;  %v5357_v1 = vpop.f32.mrb[35].mxu1 }
 0x146   : > { %6598 = vst [vmem:[#allocation55_spill] sm:$0xff] %v5357_v1  ;;  %v988_v16 = vadd.f32 %v987_v0, %v986_v58  ;;  %v1808_v13 = vadd.f32 %v5357_v1, %v5347_v57 }
 0x147   : > { %v563_v21 = vrot.slane %v562_v20, 2  ;;  %v1383_v14 = vadd.f32 %v5340_v48, %v1382_v27 }
 0x148   : > { %v989_v24 = vrot.slane %v988_v16, 2  ;;  %v1809_v18 = vadd.f32 %v5343_v23, %v1808_v13 }
 0x149   : > { %v564_v5 = vadd.f32 %v563_v21, %v562_v20  ;;  %v5363_v62 = vpop.f32.mrb[36].mxu0  ;;  %v1384_v55 = vadd.f32 %v5349_v42, %v1383_v14 }
 0x14a   : > { %6599 = vst [vmem:[#allocation56_spill] sm:$0xff] %v5363_v62  ;;  %v990_v7 = vadd.f32 %v989_v24, %v988_v16  ;;  %v5366_v8 = vpop.f32.mrb[36].mxu1  ;;  %v5368_v26 = vpop.f32.mrb[37].mxu0  ;;  %v1810_v58 = vadd.f32 %v5351_v41, %v1809_v18 }
 0x14b   : > { %6600 = vst [vmem:[#allocation57_spill] sm:$0xff] %v5366_v8  ;;  %6601 = vst [vmem:[#allocation58_spill] sm:$0xff] %v5368_v26  ;;  %v565_v0 = vrot.slane %v564_v5, 1  ;;  %v1385_v1 = vadd.f32 %v1384_v55, %v5368_v26  ;;  %v5372_v57 = vpop.f32.mrb[37].mxu1  ;;  %v5374_v27 = vpop.f32.mrb[38].mxu0 }
 0x14c   : > { %6602 = vst [vmem:[#allocation59_spill] sm:$0xff] %v5372_v57  ;;  %6603 = vst [vmem:[#allocation60_spill] sm:$0xff] %v5374_v27  ;;  %v991_v13 = vrot.slane %v990_v7, 1  ;;  %v1811_v21 = vadd.f32 %v1810_v58, %v5372_v57  ;;  %v5377_v20 = vpop.f32.mrb[38].mxu1  ;;  %v5379_v14 = vpop.f32.mrb[39].mxu0 }
 0x14d   : > { %6604 = vst [vmem:[#allocation61_spill] sm:$0xff] %v5377_v20  ;;  %6605 = vst [vmem:[#allocation62_spill] sm:$0xff] %v5379_v14  ;;  %v566_v24 = vadd.f32 %v565_v0, %v564_v5  ;;  %v1386_v16 = vadd.f32 %v1385_v1, %v5379_v14  ;;  %v5382_v23 = vpop.f32.mrb[39].mxu1 }
 0x14e   : > { %6606 = vst [vmem:[#allocation63_spill] sm:$0xff] %v5382_v23  ;;  %v992_v18 = vadd.f32 %v991_v13, %v990_v7  ;;  %v1812_v41 = vadd.f32 %v1811_v21, %v5382_v23 }
 0x14f   : > { %v1387_v55 = vadd.f32 %v5363_v62, %v1386_v16 }
 0x150   : > { %v5386_v26 = vadd.f32 %v992_v18, %v566_v24  ;;  %v1813_v42 = vadd.f32 %v5366_v8, %v1812_v41 }
 0x151   : > { %v5389_v48 = vpop.f32.mrb[40].mxu0  ;;  %v1388_v58 = vadd.f32 %v5374_v27, %v1387_v55 }
 0x152   : > { %6607 = vst [vmem:[#allocation64_spill] sm:$0xff] %v5389_v48  ;;  %v5392_v57 = vpop.f32.mrb[40].mxu1  ;;  %v5394_v5 = vpop.f32.mrb[41].mxu0  ;;  %v1814_v1 = vadd.f32 %v5377_v20, %v1813_v42 }
 0x153   : > { %6608 = vst [vmem:[#allocation65_spill] sm:$0xff] %v5392_v57  ;;  %6609 = vst [vmem:[#allocation66_spill] sm:$0xff] %v5394_v5  ;;  %v1389_v7 = vadd.f32 %v1388_v58, %v5394_v5  ;;  %v5398_v0 = vpop.f32.mrb[41].mxu1  ;;  %v5400_v13 = vpop.f32.mrb[42].mxu0 }
 0x154   : > { %6610 = vst [vmem:[#allocation67_spill] sm:$0xff] %v5398_v0  ;;  %6611 = vst [vmem:[#allocation68_spill] sm:$0xff] %v5400_v13  ;;  %v1815_v21 = vadd.f32 %v1814_v1, %v5398_v0  ;;  %v5403_v24 = vpop.f32.mrb[42].mxu1  ;;  %v5405_v41 = vpop.f32.mrb[43].mxu0 }
 0x155   : > { %6612 = vst [vmem:[#allocation69_spill] sm:$0xff] %v5403_v24  ;;  %6613 = vst [vmem:[#allocation70_spill] sm:$0xff] %v5405_v41  ;;  %v1390_v16 = vadd.f32 %v1389_v7, %v5405_v41  ;;  %v5408_v18 = vpop.f32.mrb[43].mxu1 }
 0x156   : > { %6614 = vst [vmem:[#allocation71_spill] sm:$0xff] %v5408_v18  ;;  %v1816_v55 = vadd.f32 %v1815_v21, %v5408_v18 }
 0x157   : > { %v1391_v42 = vadd.f32 %v5389_v48, %v1390_v16 }
 0x158   : > { %v1817_v58 = vadd.f32 %v5392_v57, %v1816_v55 }
 0x159   : > { %v5413_v20 = vpop.f32.mrb[44].mxu0  ;;  %v1392_v8 = vadd.f32 %v5400_v13, %v1391_v42 }
 0x15a   : > { %6615 = vst [vmem:[#allocation72_spill] sm:$0xff] %v5413_v20  ;;  %v5416_v23 = vpop.f32.mrb[44].mxu1  ;;  %v5418_v1 = vpop.f32.mrb[45].mxu0  ;;  %v1818_v0 = vadd.f32 %v5403_v24, %v1817_v58 }
 0x15b   : > { %6616 = vst [vmem:[#allocation73_spill] sm:$0xff] %v5416_v23  ;;  %6617 = vst [vmem:[#allocation74_spill] sm:$0xff] %v5418_v1  ;;  %v1393_v7 = vadd.f32 %v1392_v8, %v5418_v1  ;;  %v5422_v41 = vpop.f32.mrb[45].mxu1  ;;  %v5424_v5 = vpop.f32.mrb[46].mxu0 }
 0x15c   : > { %6618 = vst [vmem:[#allocation75_spill] sm:$0xff] %v5422_v41  ;;  %6619 = vst [vmem:[#allocation76_spill] sm:$0xff] %v5424_v5  ;;  %v1819_v21 = vadd.f32 %v1818_v0, %v5422_v41  ;;  %v5427_v16 = vpop.f32.mrb[46].mxu1  ;;  %v5429_v55 = vpop.f32.mrb[47].mxu0 }
 0x15d   : > { %6620 = vst [vmem:[#allocation77_spill] sm:$0xff] %v5427_v16  ;;  %6621 = vst [vmem:[#allocation78_spill] sm:$0xff] %v5429_v55  ;;  %v1394_v42 = vadd.f32 %v1393_v7, %v5429_v55  ;;  %v5432_v57 = vpop.f32.mrb[47].mxu1 }
 0x15e   : > { %6622 = vst [vmem:[#allocation79_spill] sm:$0xff] %v5432_v57  ;;  %v1820_v18 = vadd.f32 %v1819_v21, %v5432_v57 }
 0x15f   : > { %v1395_v58 = vadd.f32 %v5413_v20, %v1394_v42 }
 0x160   : > { %v1821_v8 = vadd.f32 %v5416_v23, %v1820_v18 }
 0x161   : > { %v5437_v24 = vpop.f32.mrb[48].mxu0  ;;  %v1396_v1 = vadd.f32 %v5424_v5, %v1395_v58 }
 0x162   : > { %6623 = vst [vmem:[#allocation80_spill] sm:$0xff] %v5437_v24  ;;  %v5440_v13 = vpop.f32.mrb[48].mxu1  ;;  %v5442_v0 = vpop.f32.mrb[49].mxu0  ;;  %v1822_v41 = vadd.f32 %v5427_v16, %v1821_v8 }
 0x163   : > { %6624 = vst [vmem:[#allocation81_spill] sm:$0xff] %v5440_v13  ;;  %6625 = vst [vmem:[#allocation82_spill] sm:$0xff] %v5442_v0  ;;  %v1397_v7 = vadd.f32 %v1396_v1, %v5442_v0  ;;  %v5446_v55 = vpop.f32.mrb[49].mxu1  ;;  %v5448_v48 = vpop.f32.mrb[50].mxu0 }
 0x164   : > { %6626 = vst [vmem:[#allocation83_spill] sm:$0xff] %v5446_v55  ;;  %6627 = vst [vmem:[#allocation84_spill] sm:$0xff] %v5448_v48  ;;  %v1823_v21 = vadd.f32 %v1822_v41, %v5446_v55  ;;  %v5451_v42 = vpop.f32.mrb[50].mxu1  ;;  %v5453_v18 = vpop.f32.mrb[51].mxu0 }
 0x165   : > { %6628 = vst [vmem:[#allocation85_spill] sm:$0xff] %v5451_v42  ;;  %6629 = vst [vmem:[#allocation86_spill] sm:$0xff] %v5453_v18  ;;  %v1398_v58 = vadd.f32 %v1397_v7, %v5453_v18  ;;  %v5456_v23 = vpop.f32.mrb[51].mxu1 }
 0x166   : > { %6630 = vst [vmem:[#allocation87_spill] sm:$0xff] %v5456_v23  ;;  %v1824_v57 = vadd.f32 %v1823_v21, %v5456_v23 }
 0x167   : > { %v1399_v8 = vadd.f32 %v5437_v24, %v1398_v58 }
 0x168   : > { %v1825_v1 = vadd.f32 %v5440_v13, %v1824_v57 }
 0x169   : > { %v5461_v16 = vpop.f32.mrb[52].mxu0  ;;  %v1400_v0 = vadd.f32 %v5448_v48, %v1399_v8 }
 0x16a   : > { %6631 = vst [vmem:[#allocation88_spill] sm:$0xff] %v5461_v16  ;;  %v5464_v5 = vpop.f32.mrb[52].mxu1  ;;  %v5466_v41 = vpop.f32.mrb[53].mxu0  ;;  %v1826_v55 = vadd.f32 %v5451_v42, %v1825_v1 }
 0x16b   : > { %6632 = vst [vmem:[#allocation89_spill] sm:$0xff] %v5464_v5  ;;  %6633 = vst [vmem:[#allocation90_spill] sm:$0xff] %v5466_v41  ;;  %v1401_v7 = vadd.f32 %v1400_v0, %v5466_v41  ;;  %v5470_v18 = vpop.f32.mrb[53].mxu1  ;;  %v5472_v20 = vpop.f32.mrb[54].mxu0 }
 0x16c   : > { %6634 = vst [vmem:[#allocation91_spill] sm:$0xff] %v5470_v18  ;;  %6635 = vst [vmem:[#allocation92_spill] sm:$0xff] %v5472_v20  ;;  %v1827_v21 = vadd.f32 %v1826_v55, %v5470_v18  ;;  %v5475_v58 = vpop.f32.mrb[54].mxu1  ;;  %v5477_v57 = vpop.f32.mrb[55].mxu0 }
 0x16d   : > { %6636 = vst [vmem:[#allocation93_spill] sm:$0xff] %v5475_v58  ;;  %6637 = vst [vmem:[#allocation94_spill] sm:$0xff] %v5477_v57  ;;  %v1402_v8 = vadd.f32 %v1401_v7, %v5477_v57  ;;  %v5480_v13 = vpop.f32.mrb[55].mxu1 }
 0x16e   : > { %6638 = vst [vmem:[#allocation95_spill] sm:$0xff] %v5480_v13  ;;  %v1828_v23 = vadd.f32 %v1827_v21, %v5480_v13 }
 0x16f   : > { %v1403_v1 = vadd.f32 %v5461_v16, %v1402_v8 }
 0x170   : > { %v1829_v0 = vadd.f32 %v5464_v5, %v1828_v23 }
 0x171   : > { %v5485_v42 = vpop.f32.mrb[56].mxu0  ;;  %v1404_v41 = vadd.f32 %v5472_v20, %v1403_v1 }
 0x172   : > { %6639 = vst [vmem:[#allocation96_spill] sm:$0xff] %v5485_v42  ;;  %v5488_v48 = vpop.f32.mrb[56].mxu1  ;;  %v5490_v55 = vpop.f32.mrb[57].mxu0  ;;  %v1830_v18 = vadd.f32 %v5475_v58, %v1829_v0 }
 0x173   : > { %6640 = vst [vmem:[#allocation97_spill] sm:$0xff] %v5488_v48  ;;  %6641 = vst [vmem:[#allocation98_spill] sm:$0xff] %v5490_v55  ;;  %v1405_v7 = vadd.f32 %v1404_v41, %v5490_v55  ;;  %v5494_v57 = vpop.f32.mrb[57].mxu1  ;;  %v5496_v24 = vpop.f32.mrb[58].mxu0 }
 0x174   : > { %6642 = vst [vmem:[#allocation99_spill] sm:$0xff] %v5494_v57  ;;  %6643 = vst [vmem:[#allocation100_spill] sm:$0xff] %v5496_v24  ;;  %v1831_v21 = vadd.f32 %v1830_v18, %v5494_v57  ;;  %v5499_v8 = vpop.f32.mrb[58].mxu1  ;;  %v5501_v23 = vpop.f32.mrb[59].mxu0 }
 0x175   : > { %6644 = vst [vmem:[#allocation101_spill] sm:$0xff] %v5499_v8  ;;  %6645 = vst [vmem:[#allocation102_spill] sm:$0xff] %v5501_v23  ;;  %v1406_v1 = vadd.f32 %v1405_v7, %v5501_v23  ;;  %v5504_v5 = vpop.f32.mrb[59].mxu1 }
 0x176   : > { %6646 = vst [vmem:[#allocation103_spill] sm:$0xff] %v5504_v5  ;;  %v1832_v13 = vadd.f32 %v1831_v21, %v5504_v5 }
 0x177   : > { %v1407_v0 = vadd.f32 %v5485_v42, %v1406_v1 }
 0x178   : > { %v1833_v41 = vadd.f32 %v5488_v48, %v1832_v13 }
 0x179   : > { %v5509_v58 = vpop.f32.mrb[60].mxu0  ;;  %v1408_v55 = vadd.f32 %v5496_v24, %v1407_v0 }
 0x17a   : > { %6647 = vst [vmem:[#allocation104_spill] sm:$0xff] %v5509_v58  ;;  %v5512_v20 = vpop.f32.mrb[60].mxu1  ;;  %v5514_v18 = vpop.f32.mrb[61].mxu0  ;;  %v1834_v57 = vadd.f32 %v5499_v8, %v1833_v41 }
 0x17b   : > { %6648 = vst [vmem:[#allocation105_spill] sm:$0xff] %v5512_v20  ;;  %6649 = vst [vmem:[#allocation106_spill] sm:$0xff] %v5514_v18  ;;  %v1409_v7 = vadd.f32 %v1408_v55, %v5514_v18  ;;  %v5518_v23 = vpop.f32.mrb[61].mxu1  ;;  %v5520_v16 = vpop.f32.mrb[62].mxu0 }
 0x17c   : > { %6650 = vst [vmem:[#allocation107_spill] sm:$0xff] %v5518_v23  ;;  %6651 = vst [vmem:[#allocation108_spill] sm:$0xff] %v5520_v16  ;;  %v1835_v21 = vadd.f32 %v1834_v57, %v5518_v23  ;;  %v5523_v1 = vpop.f32.mrb[62].mxu1  ;;  %v5525_v13 = vpop.f32.mrb[63].mxu0 }
 0x17d   : > { %6652 = vst [vmem:[#allocation109_spill] sm:$0xff] %v5523_v1  ;;  %6653 = vst [vmem:[#allocation110_spill] sm:$0xff] %v5525_v13  ;;  %v1410_v0 = vadd.f32 %v1409_v7, %v5525_v13  ;;  %v5528_v48 = vpop.f32.mrb[63].mxu1 }
 0x17e   : > { %6654 = vst [vmem:[#allocation111_spill] sm:$0xff] %v5528_v48  ;;  %v1836_v5 = vadd.f32 %v1835_v21, %v5528_v48 }
 0x17f   : > { %v1411_v41 = vadd.f32 %v5509_v58, %v1410_v0 }
 0x180   : > { %v1837_v55 = vadd.f32 %v5512_v20, %v1836_v5 }
 0x181   : > { %v1412_v8 = vadd.f32 %v5520_v16, %v1411_v41 }
 0x182   : > { %v1838_v18 = vadd.f32 %v5523_v1, %v1837_v55 }
 0x183   : > { %v1413_v24 = vrot.slane %v1412_v8, 4 }
 0x184   : > { %v1839_v57 = vrot.slane %v1838_v18, 4 }
 0x185   : > { %v1414_v23 = vadd.f32 %v1413_v24, %v1412_v8 }
 0x186   : > { %v1840_v42 = vadd.f32 %v1839_v57, %v1838_v18 }
 0x187   : > { %v1415_v27 = vrot.slane %v1414_v23, 2 }
 0x188   : > { %v1841_v62 = vrot.slane %v1840_v42, 2 }
 0x189   : > { %v1416_v14 = vadd.f32 %v1415_v27, %v1414_v23 }
 0x18a   : > { %v1842_v7 = vadd.f32 %v1841_v62, %v1840_v42 }
 0x18b   : > { %v1417_v13 = vrot.slane %v1416_v14, 1 }
 0x18c   : > { %v1843_v30 = vrot.slane %v1842_v7, 1 }
 0x18d   : > { %v1418_v10 = vadd.f32 %v1417_v13, %v1416_v14 }
 0x18e   : > { %v1844_v0 = vadd.f32 %v1843_v30, %v1842_v7 }
 0x18f   : > { %v1419_v21 = vadd.f32 %v1418_v10, %v5386_v26 }
 0x191   : > { %v1845_v48 = vadd.f32 %v1844_v0, %v1419_v21 }
 0x193   : > { %v5536_v5 = vmul.f32 0.0009765625, %v1845_v48 }
 0x195   : > { %v1879_v41 = vsub.f32 %v5153_v34, %v5536_v5  ;;  %v1880_v24 = vsub.f32 %v5161_v38, %v5536_v5  ;;  %v1881_v8 = vsub.f32 %v5149_v32, %v5536_v5  ;;  %v1882_v14 = vsub.f32 %v5157_v36, %v5536_v5 }
 0x196   : > { %v1883_v30 = vsub.f32 %v5176_v47, %v5536_v5  ;;  %v1884_v26 = vsub.f32 %v5187_v54, %v5536_v5  ;;  %v1885_v18 = vsub.f32 %v5171_v44, %v5536_v5  ;;  %v1886_v57 = vsub.f32 %v5182_v51, %v5536_v5 }
 0x197   : > { %v1911_v27 = vmul.f32 %v1879_v41, %v1879_v41  ;;  %v1912_v62 = vmul.f32 %v1880_v24, %v1880_v24  ;;  %v1913_v10 = vmul.f32 %v1881_v8, %v1881_v8  ;;  %v1914_v42 = vmul.f32 %v1882_v14, %v1882_v14 }
 0x198   : > { %v1915_v13 = vmul.f32 %v1883_v30, %v1883_v30  ;;  %v1916_v7 = vmul.f32 %v1884_v26, %v1884_v26  ;;  %v1887_v0 = vsub.f32 %v5200_v63, %v5536_v5  ;;  %v1917_v41 = vmul.f32 %v1885_v18, %v1885_v18 }
 0x199   : > { %v1943_v48 = vadd.f32 %v1912_v62, %v1911_v27  ;;  %v1888_v8 = vsub.f32 %v5211_v6, %v5536_v5  ;;  %v1918_v27 = vmul.f32 %v1886_v57, %v1886_v57  ;;  %v2013_v14 = vsub.f32 %v5155_v35, %v5536_v5 }
 0x19a   : > { %v2014_v30 = vsub.f32 %v5165_v40, %v5536_v5 }
 0x19b   : > { %v1944_v23 = vadd.f32 %v1943_v48, %v1913_v10  ;;  %v1889_v10 = vsub.f32 %v5195_v60, %v5536_v5  ;;  %v1919_v48 = vmul.f32 %v1887_v0, %v1887_v0  ;;  %v1893_v0 = vsub.f32 %v5219_v12, %v5536_v5 }
 0x19c   : > { %v2046_v57 = vmul.f32 %v2014_v30, %v2014_v30 }
 0x19d   : > { %v1945_v55 = vadd.f32 %v1944_v23, %v1914_v42  ;;  %v1890_v42 = vsub.f32 %v5206_v3, %v5536_v5  ;;  %v1920_v23 = vmul.f32 %v1888_v8, %v1888_v8  ;;  %v2016_v8 = vsub.f32 %v5159_v37, %v5536_v5 }
 0x19e   : > { %v1899_v37 = vsub.f32 %v5272_v4, %v5536_v5 }
 0x19f   : > { %v1946_v21 = vadd.f32 %v1945_v55, %v1915_v13  ;;  %v2015_v13 = vsub.f32 %v5151_v33, %v5536_v5  ;;  %v2045_v55 = vmul.f32 %v2013_v14, %v2013_v14  ;;  %v1896_v14 = vsub.f32 %v5259_v49, %v5536_v5 }
 0x1a0   : > { %v1922_v30 = vmul.f32 %v1890_v42, %v1890_v42  ;;  %v2018_v42 = vsub.f32 %v5190_v56, %v5536_v5  ;;  %v1925_v56 = vmul.f32 %v1893_v0, %v1893_v0  ;;  %v2021_v0 = vsub.f32 %v5204_v2, %v5536_v5 }
 0x1a1   : > { %v1947_v24 = vadd.f32 %v1946_v21, %v1916_v7  ;;  %v1891_v7 = vsub.f32 %v5224_v15, %v5536_v5  ;;  %v1892_v21 = vsub.f32 %v5235_v22, %v5536_v5  ;;  %v2047_v33 = vmul.f32 %v2015_v13, %v2015_v13 }
 0x1a2   : > { %v1900_v13 = vsub.f32 %v5283_v17, %v5536_v5 }
 0x1a3   : > { %v1948_v62 = vadd.f32 %v1947_v24, %v1917_v41  ;;  %v1921_v41 = vmul.f32 %v1889_v10, %v1889_v10  ;;  %v2077_v10 = vadd.f32 %v2046_v57, %v2045_v55  ;;  %v1923_v40 = vmul.f32 %v1891_v7, %v1891_v7 }
 0x1a4   : > { %v1901_v55 = vsub.f32 %v5267_v61, %v5536_v5  ;;  %v1902_v57 = vsub.f32 %v5278_v11, %v5536_v5  ;;  %v2019_v7 = vsub.f32 %v5174_v46, %v5536_v5  ;;  %v1931_v11 = vmul.f32 %v1899_v37, %v1899_v37 }
 0x1a5   : > { %v1949_v26 = vadd.f32 %v1948_v62, %v1918_v27  ;;  %v1894_v27 = vsub.f32 %v5230_v19, %v5536_v5  ;;  %v1895_v62 = vsub.f32 %v5248_v31, %v5536_v5  ;;  %v1932_v2 = vmul.f32 %v1900_v13, %v1900_v13 }
 0x1a6   : > { %v1933_v4 = vmul.f32 %v1901_v55, %v1901_v55  ;;  %v6661_v55 = vld [vmem:[#allocation16_spill] sm:$0xff] }
 0x1a7   : > { %v1950_v18 = vadd.f32 %v1949_v26, %v1919_v48  ;;  %v2017_v26 = vsub.f32 %v5180_v50, %v5536_v5  ;;  %v1924_v50 = vmul.f32 %v1892_v21, %v1892_v21  ;;  %v2020_v21 = vsub.f32 %v5185_v53, %v5536_v5 }
 0x1a8   : > { %v1926_v46 = vmul.f32 %v1894_v27, %v1894_v27  ;;  %v1927_v53 = vmul.f32 %v1895_v62, %v1895_v62  ;;  %v6658_v62 = vld [vmem:[#allocation50_spill] sm:$0xff] }
 0x1a9   : > { %v1951_v24 = vadd.f32 %v1950_v18, %v1920_v23  ;;  %v1897_v23 = vsub.f32 %v5243_v28, %v5536_v5  ;;  %v1898_v18 = vsub.f32 %v5254_v43, %v5536_v5 }
 0x1ab   : > { %v1952_v48 = vadd.f32 %v1951_v24, %v1921_v41  ;;  %v2048_v41 = vmul.f32 %v2016_v8, %v2016_v8  ;;  %v2078_v24 = vadd.f32 %v2077_v10, %v2047_v33  ;;  %v1903_v8 = vsub.f32 %v5296_v45, %v5536_v5 }
 0x1ac   : > { %v1904_v33 = vsub.f32 %v5307_v9, %v5536_v5  ;;  %v1905_v10 = vsub.f32 %v5291_v29, %v5536_v5 }
 0x1ad   : > { %v1953_v35 = vadd.f32 %v1952_v48, %v1922_v30  ;;  %v2049_v30 = vmul.f32 %v2017_v26, %v2017_v26  ;;  %v2079_v48 = vadd.f32 %v2078_v24, %v2048_v41  ;;  %v1906_v26 = vsub.f32 %v5302_v59, %v5536_v5 }
 0x1ae   : > { %v1907_v41 = vsub.f32 %v5320_v52, %v5536_v5  ;;  %v1908_v24 = vsub.f32 %v5331_v25, %v5536_v5  ;;  %v1928_v59 = vmul.f32 %v1896_v14, %v1896_v14  ;;  %v6656_v52 = vld [vmem:[#allocation14_spill] sm:$0xff]  ;;  %v2052_v25 = vmul.f32 %v2020_v21, %v2020_v21 }
 0x1af   : > { %v1954_v43 = vadd.f32 %v1953_v35, %v1923_v40  ;;  %v2050_v35 = vmul.f32 %v2018_v42, %v2018_v42  ;;  %v2080_v40 = vadd.f32 %v2079_v48, %v2049_v30  ;;  %v1909_v42 = vsub.f32 %v5315_v39, %v5536_v5  ;;  %v6655_v30 = vld [vmem:[#allocation44_spill] sm:$0xff] }
 0x1b0   : > { %v1910_v48 = vsub.f32 %v6655_v30, %v5536_v5  ;;  %v2022_v45 = vsub.f32 %v6656_v52, %v5536_v5  ;;  %v2053_v39 = vmul.f32 %v2021_v0, %v2021_v0  ;;  %v1934_v30 = vmul.f32 %v1902_v57, %v1902_v57 }
 0x1b1   : > { %v1955_v61 = vadd.f32 %v1954_v43, %v1924_v50  ;;  %v2051_v50 = vmul.f32 %v2019_v7, %v2019_v7  ;;  %v2081_v43 = vadd.f32 %v2080_v40, %v2050_v35  ;;  %v6657_v35 = vld [vmem:[#allocation11_spill] sm:$0xff]  ;;  %v5632_v0 = vmul.f32 %v1906_v26, %v1906_v26 }
 0x1b2   : > { %v2023_v40 = vsub.f32 %v6657_v35, %v5536_v5  ;;  %v2054_v37 = vmul.f32 %v2022_v45, %v2022_v45  ;;  %v2025_v57 = vsub.f32 %v6661_v55, %v5536_v5  ;;  %v5642_v26 = vmul.f32 %v1908_v24, %v1908_v24 }
 0x1b3   : > { %v1956_v9 = vadd.f32 %v1955_v61, %v1925_v56  ;;  %v2082_v27 = vadd.f32 %v2081_v43, %v2051_v50  ;;  %v1929_v56 = vmul.f32 %v1897_v23, %v1897_v23  ;;  %v1930_v61 = vmul.f32 %v1898_v18, %v1898_v18  ;;  %v6660_v23 = vld [vmem:[#allocation13_spill] sm:$0xff] }
 0x1b4   : > { %v2024_v18 = vsub.f32 %v6660_v23, %v5536_v5  ;;  %v5630_v50 = vmul.f32 %v1905_v10, %v1905_v10  ;;  %v2055_v43 = vmul.f32 %v2023_v40, %v2023_v40  ;;  %v6671_v23 = vld [vmem:[#allocation19_spill] sm:$0xff] }
 0x1b5   : > { %v1957_v29 = vadd.f32 %v1956_v9, %v1926_v46  ;;  %v2083_v17 = vadd.f32 %v2082_v27, %v2052_v25  ;;  %v2147_v46 = vsub.f32 %v6658_v62, %v5536_v5  ;;  %v6659_v9 = vld [vmem:[#allocation54_spill] sm:$0xff]  ;;  %v5636_v62 = vmul.f32 %v1907_v41, %v1907_v41  ;;  %v6664_v41 = vld [vmem:[#allocation52_spill] sm:$0xff] }
 0x1b6   : > { %v2148_v14 = vsub.f32 %v6659_v9, %v5536_v5  ;;  %v2150_v40 = vsub.f32 %v6664_v41, %v5536_v5 }
 0x1b7   : > { %v1958_v7 = vadd.f32 %v1957_v29, %v1927_v53  ;;  %v2084_v13 = vadd.f32 %v2083_v17, %v2053_v39  ;;  %v1935_v53 = vmul.f32 %v1903_v8, %v1903_v8  ;;  %v1936_v29 = vmul.f32 %v1904_v33, %v1904_v33  ;;  %v6663_v39 = vld [vmem:[#allocation18_spill] sm:$0xff] }
 0x1b8   : > { %v2179_v9 = vmul.f32 %v2147_v46, %v2147_v46  ;;  %v2180_v45 = vmul.f32 %v2148_v14, %v2148_v14  ;;  %v2026_v8 = vsub.f32 %v6663_v39, %v5536_v5  ;;  %v2056_v33 = vmul.f32 %v2024_v18, %v2024_v18  ;;  %v6667_v18 = vld [vmem:[#allocation58_spill] sm:$0xff] }
 0x1b9   : > { %v1959_v21 = vadd.f32 %v1958_v7, %v1928_v59  ;;  %v2085_v27 = vadd.f32 %v2084_v13, %v2054_v37  ;;  %v6662_v59 = vld [vmem:[#allocation48_spill] sm:$0xff]  ;;  %v6665_v13 = vld [vmem:[#allocation15_spill] sm:$0xff]  ;;  %v2057_v14 = vmul.f32 %v2025_v57, %v2025_v57  ;;  %v2151_v24 = vsub.f32 %v6667_v18, %v5536_v5  ;;  %v6670_v57 = vld [vmem:[#allocation62_spill] sm:$0xff] }
 0x1ba   : > { %v2149_v7 = vsub.f32 %v6662_v59, %v5536_v5  ;;  %v2027_v46 = vsub.f32 %v6665_v13, %v5536_v5  ;;  %v2058_v55 = vmul.f32 %v2026_v8, %v2026_v8  ;;  %v2031_v18 = vsub.f32 %v6671_v23, %v5536_v5  ;;  %v6673_v8 = vld [vmem:[#allocation56_spill] sm:$0xff]  ;;  %v6677_v23 = vld [vmem:[#allocation25_spill] sm:$0xff] }
 0x1bb   : > { %v1960_v25 = vadd.f32 %v1959_v21, %v1929_v56  ;;  %v2086_v10 = vadd.f32 %v2085_v27, %v2055_v43  ;;  %v5644_v56 = vmul.f32 %v1909_v42, %v1909_v42  ;;  %v5646_v21 = vmul.f32 %v1910_v48, %v1910_v48  ;;  %v6668_v48 = vld [vmem:[#allocation20_spill] sm:$0xff] }
 0x1bc   : > { %v2181_v43 = vmul.f32 %v2149_v7, %v2149_v7  ;;  %v2211_v42 = vadd.f32 %v2180_v45, %v2179_v9  ;;  %v2029_v39 = vsub.f32 %v6668_v48, %v5536_v5  ;;  %v2059_v7 = vmul.f32 %v2027_v46, %v2027_v46  ;;  %v6674_v48 = vld [vmem:[#allocation27_spill] sm:$0xff]  ;;  %v6676_v46 = vld [vmem:[#allocation60_spill] sm:$0xff] }
 0x1bd   : > { %v1961_v17 = vadd.f32 %v1960_v25, %v1930_v61  ;;  %v2087_v61 = vadd.f32 %v2086_v10, %v2056_v33  ;;  %v6666_v25 = vld [vmem:[#allocation17_spill] sm:$0xff]  ;;  %v2152_v33 = vsub.f32 %v6670_v57, %v5536_v5  ;;  %v2182_v10 = vmul.f32 %v2150_v40, %v2150_v40 }
 0x1be   : > { %v2028_v59 = vsub.f32 %v6666_v25, %v5536_v5  ;;  %v2212_v13 = vadd.f32 %v2211_v42, %v2181_v43  ;;  %v2033_v57 = vsub.f32 %v6674_v48, %v5536_v5  ;;  %v6680_v48 = vld [vmem:[#allocation35_spill] sm:$0xff] }
 0x1bf   : > { %v1962_v37 = vadd.f32 %v1961_v17, %v1931_v11  ;;  %v2088_v41 = vadd.f32 %v2087_v61, %v2057_v14  ;;  %v6669_v11 = vld [vmem:[#allocation23_spill] sm:$0xff]  ;;  %v2183_v14 = vmul.f32 %v2151_v24, %v2151_v24  ;;  %v2061_v24 = vmul.f32 %v2029_v39, %v2029_v39  ;;  %v6682_v39 = vld [vmem:[#allocation70_spill] sm:$0xff] }
 0x1c0   : > { %v2030_v17 = vsub.f32 %v6669_v11, %v5536_v5  ;;  %v2213_v61 = vadd.f32 %v2212_v13, %v2182_v10  ;;  %v2060_v40 = vmul.f32 %v2028_v59, %v2028_v59  ;;  %v6679_v59 = vld [vmem:[#allocation66_spill] sm:$0xff] }
 0x1c1   : > { %v1963_v27 = vadd.f32 %v1962_v37, %v1932_v2  ;;  %v2089_v9 = vadd.f32 %v2088_v41, %v2058_v55  ;;  %v6672_v2 = vld [vmem:[#allocation22_spill] sm:$0xff]  ;;  %v2153_v37 = vsub.f32 %v6673_v8, %v5536_v5  ;;  %v2154_v55 = vsub.f32 %v6676_v46, %v5536_v5 }
 0x1c2   : > { %v2032_v45 = vsub.f32 %v6672_v2, %v5536_v5  ;;  %v2184_v41 = vmul.f32 %v2152_v33, %v2152_v33  ;;  %v2035_v8 = vsub.f32 %v6677_v23, %v5536_v5  ;;  %v2155_v10 = vsub.f32 %v6679_v59, %v5536_v5  ;;  %v6683_v59 = vld [vmem:[#allocation33_spill] sm:$0xff] }
 0x1c3   : > { %v1964_v25 = vadd.f32 %v1963_v27, %v1933_v4  ;;  %v2090_v43 = vadd.f32 %v2089_v9, %v2059_v7  ;;  %v6675_v4 = vld [vmem:[#allocation31_spill] sm:$0xff]  ;;  %v2214_v27 = vadd.f32 %v2213_v61, %v2183_v14  ;;  %v2185_v7 = vmul.f32 %v2153_v37, %v2153_v37 }
 0x1c4   : > { %v2034_v42 = vsub.f32 %v6675_v4, %v5536_v5  ;;  %v2037_v46 = vsub.f32 %v6680_v48, %v5536_v5  ;;  %v2062_v33 = vmul.f32 %v2030_v17, %v2030_v17  ;;  %v2156_v61 = vsub.f32 %v6682_v39, %v5536_v5  ;;  %v6685_v17 = vld [vmem:[#allocation64_spill] sm:$0xff] }
 0x1c5   : > { %v1965_v11 = vadd.f32 %v1964_v25, %v1934_v30  ;;  %v2091_v13 = vadd.f32 %v2090_v43, %v2060_v40  ;;  %v6678_v30 = vld [vmem:[#allocation29_spill] sm:$0xff]  ;;  %v2215_v9 = vadd.f32 %v2214_v27, %v2184_v41  ;;  %v2186_v40 = vmul.f32 %v2154_v55, %v2154_v55  ;;  %v6686_v55 = vld [vmem:[#allocation43_spill] sm:$0xff] }
 0x1c6   : > { %v2036_v25 = vsub.f32 %v6678_v30, %v5536_v5  ;;  %v2039_v37 = vsub.f32 %v6683_v59, %v5536_v5  ;;  %v2063_v41 = vmul.f32 %v2031_v18, %v2031_v18  ;;  %v6688_v18 = vld [vmem:[#allocation68_spill] sm:$0xff] }
 0x1c7   : > { %v1966_v2 = vadd.f32 %v1965_v11, %v1935_v53  ;;  %v2092_v14 = vadd.f32 %v2091_v13, %v2061_v24  ;;  %v6681_v53 = vld [vmem:[#allocation39_spill] sm:$0xff]  ;;  %v2216_v43 = vadd.f32 %v2215_v9, %v2185_v7  ;;  %v2157_v24 = vsub.f32 %v6685_v17, %v5536_v5 }
 0x1c8   : > { %v2038_v11 = vsub.f32 %v6681_v53, %v5536_v5  ;;  %v2187_v13 = vmul.f32 %v2155_v10, %v2155_v10  ;;  %v2041_v7 = vsub.f32 %v6686_v55, %v5536_v5  ;;  %v2064_v9 = vmul.f32 %v2032_v45, %v2032_v45  ;;  %v6689_v10 = vld [vmem:[#allocation41_spill] sm:$0xff] }
 0x1c9   : > { %v1967_v4 = vadd.f32 %v1966_v2, %v1936_v29  ;;  %v2093_v29 = vadd.f32 %v2092_v14, %v2062_v33  ;;  %v6684_v2 = vld [vmem:[#allocation37_spill] sm:$0xff]  ;;  %v2217_v53 = vadd.f32 %v2216_v43, %v2186_v40  ;;  %v2158_v33 = vsub.f32 %v6688_v18, %v5536_v5 }
 0x1ca   : > { %v2040_v27 = vsub.f32 %v6684_v2, %v5536_v5  ;;  %v2188_v14 = vmul.f32 %v2156_v61, %v2156_v61  ;;  %v5703_v40 = vsub.f32 %v6689_v10, %v5536_v5  ;;  %v6690_v43 = vld [vmem:[#allocation45_spill] sm:$0xff]  ;;  %v2189_v17 = vmul.f32 %v2157_v24, %v2157_v24 }
 0x1cb   : > { %v1968_v30 = vadd.f32 %v1967_v4, %v5630_v50  ;;  %v2094_v50 = vadd.f32 %v2093_v29, %v2063_v41  ;;  %v6687_v4 = vld [vmem:[#allocation47_spill] sm:$0xff]  ;;  %v2218_v2 = vadd.f32 %v2217_v53, %v2187_v13  ;;  %v5707_v45 = vsub.f32 %v6690_v43, %v5536_v5  ;;  %v6691_v41 = vld [vmem:[#allocation74_spill] sm:$0xff] }
 0x1cc   : > { %v2042_v39 = vsub.f32 %v6687_v4, %v5536_v5  ;;  %v2159_v29 = vsub.f32 %v6691_v41, %v5536_v5  ;;  %v2066_v53 = vmul.f32 %v2034_v42, %v2034_v42  ;;  %v2190_v18 = vmul.f32 %v2158_v33, %v2158_v33 }
 0x1cd   : > { %v1969_v48 = vadd.f32 %v1968_v30, %v5632_v0  ;;  %v2065_v0 = vmul.f32 %v2033_v57, %v2033_v57  ;;  %v2095_v30 = vadd.f32 %v2094_v50, %v2064_v9  ;;  %v2219_v4 = vadd.f32 %v2218_v2, %v2188_v14  ;;  %v6693_v57 = vld [vmem:[#allocation51_spill] sm:$0xff] }
 0x1ce   : > { %v2281_v9 = vsub.f32 %v6693_v57, %v5536_v5  ;;  %v6694_v50 = vld [vmem:[#allocation55_spill] sm:$0xff]  ;;  %v2067_v41 = vmul.f32 %v2035_v8, %v2035_v8  ;;  %v2068_v24 = vmul.f32 %v2036_v25, %v2036_v25  ;;  %v2069_v14 = vmul.f32 %v2037_v46, %v2037_v46 }
 0x1cf   : > { %v1970_v59 = vadd.f32 %v1969_v48, %v5636_v62  ;;  %v2096_v13 = vadd.f32 %v2095_v30, %v2065_v0  ;;  %v6692_v62 = vld [vmem:[#allocation78_spill] sm:$0xff]  ;;  %v2220_v10 = vadd.f32 %v2219_v4, %v2189_v17  ;;  %v2282_v43 = vsub.f32 %v6694_v50, %v5536_v5  ;;  %v6696_v4 = vld [vmem:[#allocation76_spill] sm:$0xff]  ;;  %v6697_v50 = vld [vmem:[#allocation49_spill] sm:$0xff] }
 0x1d0   : > { %v2160_v48 = vsub.f32 %v6692_v62, %v5536_v5  ;;  %v2162_v30 = vsub.f32 %v6696_v4, %v5536_v5  ;;  %v2313_v8 = vmul.f32 %v2281_v9, %v2281_v9  ;;  %v2071_v46 = vmul.f32 %v2039_v37, %v2039_v37 }
 0x1d1   : > { %v1971_v61 = vadd.f32 %v1970_v59, %v5642_v26  ;;  %v2097_v2 = vadd.f32 %v2096_v13, %v2066_v53  ;;  %v6695_v26 = vld [vmem:[#allocation72_spill] sm:$0xff]  ;;  %v2191_v59 = vmul.f32 %v2159_v29, %v2159_v29  ;;  %v2221_v0 = vadd.f32 %v2220_v10, %v2190_v18  ;;  %v6698_v13 = vld [vmem:[#allocation82_spill] sm:$0xff] }
 0x1d2   : > { %v2161_v42 = vsub.f32 %v6695_v26, %v5536_v5  ;;  %v2192_v57 = vmul.f32 %v2160_v48, %v2160_v48  ;;  %v2314_v25 = vmul.f32 %v2282_v43, %v2282_v43  ;;  %v2163_v29 = vsub.f32 %v6698_v13, %v5536_v5 }
 0x1d3   : > { %v1972_v55 = vadd.f32 %v1971_v61, %v5644_v56  ;;  %v2098_v17 = vadd.f32 %v2097_v2, %v2067_v41  ;;  %v2222_v62 = vadd.f32 %v2221_v0, %v2191_v59  ;;  %v2283_v56 = vsub.f32 %v6697_v50, %v5536_v5  ;;  %v6700_v59 = vld [vmem:[#allocation86_spill] sm:$0xff] }
 0x1d4   : > { %v2070_v61 = vmul.f32 %v2038_v11, %v2038_v11  ;;  %v2072_v18 = vmul.f32 %v2040_v27, %v2040_v27  ;;  %v2193_v10 = vmul.f32 %v2161_v42, %v2161_v42  ;;  %v2073_v2 = vmul.f32 %v2041_v7, %v2041_v7  ;;  %v6701_v11 = vld [vmem:[#allocation59_spill] sm:$0xff]  ;;  %v6702_v27 = vld [vmem:[#allocation80_spill] sm:$0xff] }
 0x1d5   : > { %v1973_v33 = vadd.f32 %v1972_v55, %v5646_v21  ;;  %v2099_v53 = vadd.f32 %v2098_v17, %v2068_v24  ;;  %v2223_v21 = vadd.f32 %v2222_v62, %v2192_v57  ;;  %v6699_v55 = vld [vmem:[#allocation53_spill] sm:$0xff]  ;;  %v2164_v0 = vsub.f32 %v6700_v59, %v5536_v5  ;;  %v6703_v7 = vld [vmem:[#allocation63_spill] sm:$0xff] }
 0x1d6   : > { %v2284_v41 = vsub.f32 %v6699_v55, %v5536_v5  ;;  %v2194_v50 = vmul.f32 %v2162_v30, %v2162_v30  ;;  %v2285_v37 = vsub.f32 %v6701_v11, %v5536_v5  ;;  %v2315_v43 = vmul.f32 %v2283_v56, %v2283_v56 }
 0x1d7   : > { %v2100_v48 = vadd.f32 %v2099_v53, %v2069_v14  ;;  %v2224_v9 = vadd.f32 %v2223_v21, %v2193_v10  ;;  %v2345_v24 = vadd.f32 %v2314_v25, %v2313_v8  ;;  %v2074_v17 = vmul.f32 %v2042_v39, %v2042_v39  ;;  %v6704_v10 = vld [vmem:[#allocation84_spill] sm:$0xff]  ;;  %v6705_v39 = vld [vmem:[#allocation57_spill] sm:$0xff] }
 0x1d8   : > { %v2165_v62 = vsub.f32 %v6702_v27, %v5536_v5  ;;  %v2195_v57 = vmul.f32 %v2163_v29, %v2163_v29  ;;  %v2286_v14 = vsub.f32 %v6703_v7, %v5536_v5  ;;  %v2316_v53 = vmul.f32 %v2284_v41, %v2284_v41 }
 0x1d9   : > { %v2101_v13 = vadd.f32 %v2100_v48, %v2070_v61  ;;  %v2225_v42 = vadd.f32 %v2224_v9, %v2194_v50  ;;  %v2346_v55 = vadd.f32 %v2345_v24, %v2315_v43  ;;  %v1974_v59 = vrot.slane %v1973_v33, 4  ;;  %v6706_v48 = vld [vmem:[#allocation90_spill] sm:$0xff] }
 0x1da   : > { %v2166_v21 = vsub.f32 %v6704_v10, %v5536_v5  ;;  %v2196_v11 = vmul.f32 %v2164_v0, %v2164_v0  ;;  %v2287_v8 = vsub.f32 %v6705_v39, %v5536_v5  ;;  %v2317_v25 = vmul.f32 %v2285_v37, %v2285_v37  ;;  %v6708_v39 = vld [vmem:[#allocation94_spill] sm:$0xff] }
 0x1db   : > { %v2102_v30 = vadd.f32 %v2101_v13, %v2071_v46  ;;  %v2226_v56 = vadd.f32 %v2225_v42, %v2195_v57  ;;  %v2347_v61 = vadd.f32 %v2346_v55, %v2316_v53  ;;  %v2075_v50 = vmul.f32 %v5703_v40, %v5703_v40  ;;  %v6707_v46 = vld [vmem:[#allocation61_spill] sm:$0xff]  ;;  %v6709_v40 = vld [vmem:[#allocation67_spill] sm:$0xff] }
 0x1dc   : > { %v2167_v41 = vsub.f32 %v6706_v48, %v5536_v5  ;;  %v2197_v9 = vmul.f32 %v2165_v62, %v2165_v62  ;;  %v2288_v13 = vsub.f32 %v6707_v46, %v5536_v5  ;;  %v2318_v24 = vmul.f32 %v2286_v14, %v2286_v14 }
 0x1dd   : > { %v2103_v29 = vadd.f32 %v2102_v30, %v2072_v18  ;;  %v2227_v43 = vadd.f32 %v2226_v56, %v2196_v11  ;;  %v2348_v0 = vadd.f32 %v2347_v61, %v2317_v25  ;;  %v1975_v57 = vadd.f32 %v1974_v59, %v1973_v33  ;;  %v6710_v56 = vld [vmem:[#allocation88_spill] sm:$0xff] }
 0x1de   : > { %v2168_v37 = vsub.f32 %v6708_v39, %v5536_v5  ;;  %v2198_v55 = vmul.f32 %v2166_v21, %v2166_v21  ;;  %v2289_v18 = vsub.f32 %v6709_v40, %v5536_v5  ;;  %v2319_v30 = vmul.f32 %v2287_v8, %v2287_v8 }
 0x1df   : > { %v2104_v42 = vadd.f32 %v2103_v29, %v2073_v2  ;;  %v2228_v53 = vadd.f32 %v2227_v43, %v2197_v9  ;;  %v2349_v7 = vadd.f32 %v2348_v0, %v2318_v24  ;;  %v2076_v11 = vmul.f32 %v5707_v45, %v5707_v45  ;;  %v6711_v2 = vld [vmem:[#allocation71_spill] sm:$0xff]  ;;  %v6712_v43 = vld [vmem:[#allocation92_spill] sm:$0xff]  ;;  %v6713_v45 = vld [vmem:[#allocation65_spill] sm:$0xff] }
 0x1e0   : > { %v2169_v14 = vsub.f32 %v6710_v56, %v5536_v5  ;;  %v2199_v25 = vmul.f32 %v2167_v41, %v2167_v41  ;;  %v2290_v59 = vsub.f32 %v6711_v2, %v5536_v5  ;;  %v2320_v61 = vmul.f32 %v2288_v13, %v2288_v13  ;;  %v6714_v41 = vld [vmem:[#allocation98_spill] sm:$0xff] }
 0x1e1   : > { %v2105_v62 = vadd.f32 %v2104_v42, %v2074_v17  ;;  %v2229_v33 = vadd.f32 %v2228_v53, %v2198_v55  ;;  %v2350_v21 = vadd.f32 %v2349_v7, %v2319_v30  ;;  %v1976_v29 = vrot.slane %v1975_v57, 2  ;;  %v6715_v7 = vld [vmem:[#allocation69_spill] sm:$0xff] }
 0x1e2   : > { %v2170_v8 = vsub.f32 %v6712_v43, %v5536_v5  ;;  %v2200_v24 = vmul.f32 %v2168_v37, %v2168_v37  ;;  %v2291_v17 = vsub.f32 %v6713_v45, %v5536_v5  ;;  %v2321_v42 = vmul.f32 %v2289_v18, %v2289_v18  ;;  %v6716_v37 = vld [vmem:[#allocation102_spill] sm:$0xff]  ;;  %v6717_v18 = vld [vmem:[#allocation75_spill] sm:$0xff] }
 0x1e3   : > { %v2106_v9 = vadd.f32 %v2105_v62, %v2075_v50  ;;  %v2230_v0 = vadd.f32 %v2229_v33, %v2199_v25  ;;  %v2351_v40 = vadd.f32 %v2350_v21, %v2320_v61  ;;  %v2171_v55 = vsub.f32 %v6714_v41, %v5536_v5 }
 0x1e4   : > { %v2201_v53 = vmul.f32 %v2169_v14, %v2169_v14  ;;  %v2292_v13 = vsub.f32 %v6715_v7, %v5536_v5  ;;  %v2322_v50 = vmul.f32 %v2290_v59, %v2290_v59  ;;  %v1977_v62 = vadd.f32 %v1976_v29, %v1975_v57  ;;  %v6718_v14 = vld [vmem:[#allocation96_spill] sm:$0xff] }
 0x1e5   : > { %v2107_v46 = vadd.f32 %v2106_v9, %v2076_v11  ;;  %v2231_v2 = vadd.f32 %v2230_v0, %v2200_v24  ;;  %v2352_v30 = vadd.f32 %v2351_v40, %v2321_v42  ;;  %v2172_v25 = vsub.f32 %v6716_v37, %v5536_v5  ;;  %v6719_v40 = vld [vmem:[#allocation79_spill] sm:$0xff] }
 0x1e6   : > { %v2202_v33 = vmul.f32 %v2170_v8, %v2170_v8  ;;  %v2293_v11 = vsub.f32 %v6717_v18, %v5536_v5  ;;  %v2323_v61 = vmul.f32 %v2291_v17, %v2291_v17  ;;  %v2173_v24 = vsub.f32 %v6718_v14, %v5536_v5  ;;  %v6721_v17 = vld [vmem:[#allocation73_spill] sm:$0xff] }
 0x1e7   : > { %v2108_v43 = vrot.slane %v2107_v46, 4  ;;  %v2232_v45 = vadd.f32 %v2231_v2, %v2201_v53  ;;  %v2353_v21 = vadd.f32 %v2352_v30, %v2322_v50  ;;  %v2203_v0 = vmul.f32 %v2171_v55, %v2171_v55  ;;  %v6720_v2 = vld [vmem:[#allocation100_spill] sm:$0xff] }
 0x1e8   : > { %v2294_v57 = vsub.f32 %v6719_v40, %v5536_v5  ;;  %v2324_v59 = vmul.f32 %v2292_v13, %v2292_v13  ;;  %v1978_v42 = vrot.slane %v1977_v62, 1  ;;  %v2174_v8 = vsub.f32 %v6720_v2, %v5536_v5  ;;  %v6723_v13 = vld [vmem:[#allocation77_spill] sm:$0xff] }
 0x1e9   : > { %v2109_v9 = vadd.f32 %v2108_v43, %v2107_v46  ;;  %v2233_v7 = vadd.f32 %v2232_v45, %v2202_v33  ;;  %v2354_v29 = vadd.f32 %v2353_v21, %v2323_v61  ;;  %v2204_v53 = vmul.f32 %v2172_v25, %v2172_v25  ;;  %v6722_v45 = vld [vmem:[#allocation106_spill] sm:$0xff] }
 0x1ea   : > { %v2295_v46 = vsub.f32 %v6721_v17, %v5536_v5  ;;  %v2325_v43 = vmul.f32 %v2293_v11, %v2293_v11  ;;  %v2175_v55 = vsub.f32 %v6722_v45, %v5536_v5  ;;  %v2205_v33 = vmul.f32 %v2173_v24, %v2173_v24  ;;  %v6725_v11 = vld [vmem:[#allocation83_spill] sm:$0xff] }
 0x1eb   : > { %v2110_v37 = vrot.slane %v2109_v9, 2  ;;  %v2234_v18 = vadd.f32 %v2233_v7, %v2203_v0  ;;  %v2355_v50 = vadd.f32 %v2354_v29, %v2324_v59  ;;  %v2296_v61 = vsub.f32 %v6723_v13, %v5536_v5  ;;  %v6724_v7 = vld [vmem:[#allocation110_spill] sm:$0xff] }
 0x1ec   : > { %v2326_v21 = vmul.f32 %v2294_v57, %v2294_v57  ;;  %v1979_v41 = vadd.f32 %v1978_v42, %v1977_v62  ;;  %v2176_v25 = vsub.f32 %v6724_v7, %v5536_v5  ;;  %v2206_v0 = vmul.f32 %v2174_v8, %v2174_v8  ;;  %v6726_v57 = vld [vmem:[#allocation87_spill] sm:$0xff] }
 0x1ed   : > { %v2111_v30 = vadd.f32 %v2110_v37, %v2109_v9  ;;  %v2235_v40 = vadd.f32 %v2234_v18, %v2204_v53  ;;  %v2356_v14 = vadd.f32 %v2355_v50, %v2325_v43  ;;  %v2297_v37 = vsub.f32 %v6725_v11, %v5536_v5 }
 0x1ee   : > { %v2327_v9 = vmul.f32 %v2295_v46, %v2295_v46  ;;  %v2177_v18 = vsub.f32 %v5509_v58, %v5536_v5  ;;  %v2207_v24 = vmul.f32 %v2175_v55, %v2175_v55  ;;  %v2298_v62 = vsub.f32 %v6726_v57, %v5536_v5  ;;  %v6727_v46 = vld [vmem:[#allocation81_spill] sm:$0xff] }
 0x1ef   : > { %v2112_v2 = vrot.slane %v2111_v30, 1  ;;  %v2236_v17 = vadd.f32 %v2235_v40, %v2205_v33  ;;  %v2357_v59 = vadd.f32 %v2356_v14, %v2326_v21  ;;  %v2328_v42 = vmul.f32 %v2296_v61, %v2296_v61 }
 0x1f0   : > { %v2178_v40 = vsub.f32 %v5520_v16, %v5536_v5  ;;  %v2208_v8 = vmul.f32 %v2176_v25, %v2176_v25  ;;  %v2299_v14 = vsub.f32 %v6727_v46, %v5536_v5  ;;  %v2209_v21 = vmul.f32 %v2177_v18, %v2177_v18 }
 0x1f1   : > { %v2113_v29 = vadd.f32 %v2112_v2, %v2111_v30  ;;  %v2237_v53 = vadd.f32 %v2236_v17, %v2206_v0  ;;  %v2358_v43 = vadd.f32 %v2357_v59, %v2327_v9  ;;  %v2329_v2 = vmul.f32 %v2297_v37, %v2297_v37  ;;  %v6728_v17 = vld [vmem:[#allocation85_spill] sm:$0xff] }
 0x1f2   : > { %v2300_v55 = vsub.f32 %v6728_v17, %v5536_v5  ;;  %v2330_v0 = vmul.f32 %v2298_v62, %v2298_v62  ;;  %v2210_v61 = vmul.f32 %v2178_v40, %v2178_v40 }
 0x1f3   : > { %v2114_v50 = vadd.f32 %v2113_v29, %v1979_v41  ;;  %v2238_v33 = vadd.f32 %v2237_v53, %v2207_v24  ;;  %v2359_v30 = vadd.f32 %v2358_v43, %v2328_v42  ;;  %v6729_v41 = vld [vmem:[#allocation91_spill] sm:$0xff]  ;;  %v2331_v29 = vmul.f32 %v2299_v14, %v2299_v14  ;;  %v6731_v43 = vld [vmem:[#allocation89_spill] sm:$0xff] }
 0x1f4   : > { %v2301_v59 = vsub.f32 %v6729_v41, %v5536_v5  ;;  %v6730_v53 = vld [vmem:[#allocation95_spill] sm:$0xff]  ;;  %v2332_v37 = vmul.f32 %v2300_v55, %v2300_v55 }
 0x1f5   : > { %v2239_v11 = vadd.f32 %v2238_v33, %v2208_v8  ;;  %v2360_v57 = vadd.f32 %v2359_v30, %v2329_v2  ;;  %v2302_v46 = vsub.f32 %v6730_v53, %v5536_v5  ;;  %v2303_v8 = vsub.f32 %v6731_v43, %v5536_v5 }
 0x1f6   : > { %v2333_v33 = vmul.f32 %v2301_v59, %v2301_v59 }
 0x1f7   : > { %v2240_v9 = vadd.f32 %v2239_v11, %v2209_v21  ;;  %v2361_v25 = vadd.f32 %v2360_v57, %v2330_v0  ;;  %v6732_v11 = vld [vmem:[#allocation93_spill] sm:$0xff]  ;;  %v2334_v30 = vmul.f32 %v2302_v46, %v2302_v46  ;;  %v6733_v57 = vld [vmem:[#allocation99_spill] sm:$0xff] }
 0x1f8   : > { %v2304_v40 = vsub.f32 %v6732_v11, %v5536_v5  ;;  %v2305_v0 = vsub.f32 %v6733_v57, %v5536_v5 }
 0x1f9   : > { %v2241_v24 = vadd.f32 %v2240_v9, %v2210_v61  ;;  %v2362_v42 = vadd.f32 %v2361_v25, %v2331_v29  ;;  %v2335_v61 = vmul.f32 %v2303_v8, %v2303_v8  ;;  %v6734_v29 = vld [vmem:[#allocation103_spill] sm:$0xff] }
 0x1fa   : > { %v2306_v25 = vsub.f32 %v6734_v29, %v5536_v5  ;;  %v2336_v53 = vmul.f32 %v2304_v40, %v2304_v40  ;;  %v6738_v40 = vld [vmem:[#allocation111_spill] sm:$0xff] }
 0x1fb   : > { %v2242_v18 = vrot.slane %v2241_v24, 4  ;;  %v2363_v62 = vadd.f32 %v2362_v42, %v2332_v37  ;;  %v2337_v42 = vmul.f32 %v2305_v0, %v2305_v0 }
 0x1fc   : > { %v2338_v11 = vmul.f32 %v2306_v25, %v2306_v25 }
 0x1fd   : > { %v2243_v2 = vadd.f32 %v2242_v18, %v2241_v24  ;;  %v2364_v21 = vadd.f32 %v2363_v62, %v2333_v33  ;;  %v6735_v24 = vld [vmem:[#allocation97_spill] sm:$0xff] }
 0x1fe   : > { %v2307_v37 = vsub.f32 %v6735_v24, %v5536_v5  ;;  %v6736_v33 = vld [vmem:[#allocation101_spill] sm:$0xff] }
 0x1ff   : > { %v2244_v14 = vrot.slane %v2243_v2, 2  ;;  %v2365_v9 = vadd.f32 %v2364_v21, %v2334_v30  ;;  %v2308_v62 = vsub.f32 %v6736_v33, %v5536_v5 }
 0x200   : > { %v2339_v21 = vmul.f32 %v2307_v37, %v2307_v37 }
 0x201   : > { %v2245_v55 = vadd.f32 %v2244_v14, %v2243_v2  ;;  %v2366_v43 = vadd.f32 %v2365_v9, %v2335_v61  ;;  %v6737_v2 = vld [vmem:[#allocation107_spill] sm:$0xff]  ;;  %v2310_v61 = vsub.f32 %v6738_v40, %v5536_v5  ;;  %v2340_v9 = vmul.f32 %v2308_v62, %v2308_v62 }
 0x202   : > { %v2309_v30 = vsub.f32 %v6737_v2, %v5536_v5 }
 0x203   : > { %v2246_v59 = vrot.slane %v2245_v55, 1  ;;  %v2367_v18 = vadd.f32 %v2366_v43, %v2336_v53  ;;  %v2311_v53 = vsub.f32 %v5512_v20, %v5536_v5  ;;  %v2342_v25 = vmul.f32 %v2310_v61, %v2310_v61 }
 0x204   : > { %v2341_v43 = vmul.f32 %v2309_v30, %v2309_v30 }
 0x205   : > { %v2247_v46 = vadd.f32 %v2246_v59, %v2245_v55  ;;  %v2368_v57 = vadd.f32 %v2367_v18, %v2337_v42  ;;  %v2312_v55 = vsub.f32 %v5523_v1, %v5536_v5  ;;  %v2343_v59 = vmul.f32 %v2311_v53, %v2311_v53 }
 0x207   : > { %v2248_v8 = vadd.f32 %v2247_v46, %v2114_v50  ;;  %v2369_v14 = vadd.f32 %v2368_v57, %v2338_v11  ;;  %v2344_v18 = vmul.f32 %v2312_v55, %v2312_v55  ;;  %v6740_v55 = vld [vmem:[#allocation26_spill] sm:$0xff] }
 0x209   : > { %v2370_v29 = vadd.f32 %v2369_v14, %v2339_v21 }
 0x20b   : > { %v2371_v0 = vadd.f32 %v2370_v29, %v2340_v9  ;;  %v2386_v29 = vsub.f32 0.0, %v5536_v5 }
 0x20d   : > { %v2372_v50 = vadd.f32 %v2371_v0, %v2341_v43  ;;  %v6739_v0 = vld [vmem:[#allocation21_spill] sm:$0xff] }
 0x20f   : > { %v2373_v42 = vadd.f32 %v2372_v50, %v2342_v25  ;;  %v6741_v25 = vld [vmem:[#allocation30_spill] sm:$0xff]  ;;  %v6742_v50 = vld [vmem:[#allocation24_spill] sm:$0xff] }
 0x211   : > { %v2374_v37 = vadd.f32 %v2373_v42, %v2343_v59  ;;  %v6743_v59 = vld [vmem:[#allocation28_spill] sm:$0xff]  ;;  %v6744_v42 = vld [vmem:[#allocation34_spill] sm:$0xff] }
 0x213   : > { %v2375_v11 = vadd.f32 %v2374_v37, %v2344_v18  ;;  %v6745_v18 = vld [vmem:[#allocation38_spill] sm:$0xff]  ;;  %v6746_v37 = vld [vmem:[#allocation32_spill] sm:$0xff] }
 0x215   : > { %v2376_v57 = vrot.slane %v2375_v11, 4 }
 0x217   : > { %v2377_v46 = vadd.f32 %v2376_v57, %v2375_v11  ;;  %v6747_v57 = vld [vmem:[#allocation36_spill] sm:$0xff] }
 0x219   : > { %v2378_v40 = vrot.slane %v2377_v46, 2 }
 0x21b   : > { %v2379_v62 = vadd.f32 %v2378_v40, %v2377_v46 }
 0x21d   : > { %v2380_v21 = vrot.slane %v2379_v62, 1 }
 0x21f   : > { %v2381_v14 = vadd.f32 %v2380_v21, %v2379_v62  ;;  %v6748_v62 = vld [vmem:[#allocation42_spill] sm:$0xff] }
 0x221   : > { %v2382_v2 = vadd.f32 %v2381_v14, %v2248_v8  ;;  %v6749_v14 = vld [vmem:[#allocation46_spill] sm:$0xff] }
 0x223   : > { %v2383_v20 = vmul.f32 0.0009765625, %v2382_v2 }
 0x225   : > { %v2384_v30 = vadd.f32 1e-05, %v2383_v20 }
 0x227   : > { %4946 = vrsqrt.f32 %v2384_v30 }
 0x231   : > { %v5821_v9 = vpop.eup %4946 }
 0x232   : > { %v5824_v61 = vmul.f32 %v5821_v9, %v2386_v29  ;;  %v2388_v53 = vmul.f32 %v5821_v9, %v5153_v34  ;;  %v2389_v43 = vmul.f32 %v5821_v9, %v5161_v38  ;;  %v2390_v40 = vmul.f32 %v5821_v9, %v5149_v32  ;;  %v6750_v29 = vld [vmem:[#allocation40_spill] sm:$0xff] }
 0x233   : > { %v2391_v20 = vmul.f32 %v5821_v9, %v5157_v36  ;;  %v2392_v5 = vmul.f32 %v5821_v9, %v5176_v47  ;;  %v2393_v8 = vmul.f32 %v5821_v9, %v5187_v54  ;;  %v2394_v2 = vmul.f32 %v5821_v9, %v5171_v44 }
 0x234   : > { %v2395_v34 = vmul.f32 %v5821_v9, %v5182_v51  ;;  %v2396_v38 = vmul.f32 %v5821_v9, %v5200_v63  ;;  %v2397_v32 = vmul.f32 %v5821_v9, %v5211_v6  ;;  %v2398_v36 = vmul.f32 %v5821_v9, %v5195_v60 }
 0x235   : > { %v2399_v47 = vmul.f32 %v5821_v9, %v5206_v3  ;;  %v2400_v54 = vmul.f32 %v5821_v9, %v5224_v15  ;;  %v2401_v44 = vmul.f32 %v5821_v9, %v5235_v22  ;;  %v2402_v51 = vmul.f32 %v5821_v9, %v5219_v12 }
 0x236   : > { %v2403_v63 = vmul.f32 %v5821_v9, %v5230_v19  ;;  %v2404_v6 = vmul.f32 %v5821_v9, %v5248_v31  ;;  %v2405_v60 = vmul.f32 %v5821_v9, %v5259_v49  ;;  %v2406_v3 = vmul.f32 %v5821_v9, %v5243_v28 }
 0x237   : > { %v2407_v15 = vmul.f32 %v5821_v9, %v6739_v0  ;;  %v2408_v22 = vmul.f32 %v5821_v9, %v6740_v55  ;;  %v2409_v12 = vmul.f32 %v5821_v9, %v6741_v25  ;;  %v2410_v19 = vmul.f32 %v5821_v9, %v6742_v50  ;;  %v6751_v55 = vld [vmem:[#allocation44_spill] sm:$0xff] }
 0x238   : > { %v2411_v31 = vmul.f32 %v5821_v9, %v6743_v59  ;;  %v2412_v49 = vmul.f32 %v5821_v9, %v6744_v42  ;;  %v2413_v28 = vmul.f32 %v5821_v9, %v6745_v18  ;;  %v2414_v11 = vmul.f32 %v5821_v9, %v6746_v37 }
 0x239   : > { %v2415_v46 = vmul.f32 %v5821_v9, %v6747_v57  ;;  %v2416_v21 = vmul.f32 %v5821_v9, %v6748_v62  ;;  %v2417_v30 = vmul.f32 %v5821_v9, %v6749_v14  ;;  %v2418_v0 = vmul.f32 %v5821_v9, %v6750_v29 }
 0x23a   : > { %v2419_v25 = vmul.f32 %v5821_v9, %v6751_v55  ;;  %v5891_v50 = vadd.f32 %v2388_v53, %v5824_v61  ;;  %v5894_v59 = vadd.f32 %v2389_v43, %v5824_v61  ;;  %v5897_v42 = vadd.f32 %v2390_v40, %v5824_v61 }
 0x23b   : > { %v5900_v18 = vadd.f32 %v2391_v20, %v5824_v61  ;;  %v5903_v37 = vadd.f32 %v2392_v5, %v5824_v61  ;;  %v5906_v57 = vadd.f32 %v2393_v8, %v5824_v61  ;;  %v5909_v62 = vadd.f32 %v2394_v2, %v5824_v61 }
 0x23c   : > { %v2427_v53 = vadd.f32 %v2395_v34, %v5824_v61  ;;  %v2428_v43 = vadd.f32 %v2396_v38, %v5824_v61  ;;  %v2429_v14 = vadd.f32 %v2397_v32, %v5824_v61  ;;  %v2430_v40 = vadd.f32 %v2398_v36, %v5824_v61 }
 0x23d   : > { %v2431_v20 = vadd.f32 %v2399_v47, %v5824_v61  ;;  %v2432_v29 = vadd.f32 %v2400_v54, %v5824_v61  ;;  %v2433_v5 = vadd.f32 %v2401_v44, %v5824_v61  ;;  %v2434_v8 = vadd.f32 %v2402_v51, %v5824_v61 }
 0x23e   : > { %v2435_v55 = vadd.f32 %v2403_v63, %v5824_v61  ;;  %v2436_v2 = vadd.f32 %v2404_v6, %v5824_v61  ;;  %v2437_v34 = vadd.f32 %v2405_v60, %v5824_v61  ;;  %v2438_v38 = vadd.f32 %v2406_v3, %v5824_v61 }
 0x23f   : > { %v2439_v32 = vadd.f32 %v2407_v15, %v5824_v61  ;;  %v2440_v36 = vadd.f32 %v2408_v22, %v5824_v61  ;;  %v2441_v47 = vadd.f32 %v2409_v12, %v5824_v61  ;;  %v2442_v54 = vadd.f32 %v2410_v19, %v5824_v61 }
 0x240   : > { %v2443_v44 = vadd.f32 %v2411_v31, %v5824_v61  ;;  %v2444_v51 = vadd.f32 %v2412_v49, %v5824_v61  ;;  %v2445_v63 = vadd.f32 %v2413_v28, %v5824_v61  ;;  %v2446_v6 = vadd.f32 %v2414_v11, %v5824_v61 }
 0x241   : > { %v2447_v60 = vadd.f32 %v2415_v46, %v5824_v61  ;;  %v2448_v3 = vadd.f32 %v2416_v21, %v5824_v61  ;;  %v2449_v15 = vadd.f32 %v2417_v30, %v5824_v61  ;;  %v2450_v22 = vadd.f32 %v2418_v0, %v5824_v61 }
 0x242   : > { %v2451_v12 = vadd.f32 %v2419_v25, %v5824_v61  ;;  %v2452_v19 = vmax.f32 %v5891_v50, 0.0  ;;  %v2453_v31 = vmax.f32 %v5894_v59, 0.0  ;;  %v2454_v49 = vmax.f32 %v5897_v42, 0.0 }
 0x243   : > { %v2455_v28 = vmax.f32 %v5900_v18, 0.0  ;;  %v2456_v11 = vmax.f32 %v5903_v37, 0.0  ;;  %v2457_v46 = vmax.f32 %v5906_v57, 0.0  ;;  %v2458_v21 = vmax.f32 %v5909_v62, 0.0 }
 0x244   : > { %v2459_v1 = vmax.f32 %v2427_v53, 0.0  ;;  %v2460_v30 = vmax.f32 %v2428_v43, 0.0  ;;  %v2461_v33 = vmax.f32 %v2429_v14, 0.0  ;;  %v2462_v0 = vmax.f32 %v2430_v40, 0.0 }
 0x245   : > { %v2463_v24 = vmax.f32 %v2431_v20, 0.0  ;;  %v2464_v25 = vmax.f32 %v2432_v29, 0.0  ;;  %v2465_v50 = vmax.f32 %v2433_v5, 0.0  ;;  %v2466_v41 = vmax.f32 %v2434_v8, 0.0 }
 0x246   : > { %v2467_v59 = vmax.f32 %v2435_v55, 0.0  ;;  %v2468_v17 = vmax.f32 %v2436_v2, 0.0  ;;  %v2469_v42 = vmax.f32 %v2437_v34, 0.0  ;;  %v2470_v13 = vmax.f32 %v2438_v38, 0.0 }
 0x247   : > { %v2471_v18 = vmax.f32 %v2439_v32, 0.0  ;;  %v2472_v16 = vmax.f32 %v2440_v36, 0.0  ;;  %v2473_v37 = vmax.f32 %v2441_v47, 0.0  ;;  %v2474_v58 = vmax.f32 %v2442_v54, 0.0 }
 0x248   : > { %v2475_v57 = vmax.f32 %v2443_v44, 0.0  ;;  %v2476_v7 = vmax.f32 %v2444_v51, 0.0  ;;  %v2477_v62 = vmax.f32 %v2445_v63, 0.0  ;;  %v2478_v53 = vmax.f32 %v2446_v6, 0.0  ;;  %v6754_v6 = vld [vmem:[#allocation3_spill] sm:$0xff] }
 0x249   : > { %v2479_v43 = vmax.f32 %v2447_v60, 0.0  ;;  %v2480_v14 = vmax.f32 %v2448_v3, 0.0  ;;  %v2481_v40 = vmax.f32 %v2449_v15, 0.0  ;;  %v2482_v20 = vmax.f32 %v2450_v22, 0.0  ;;  %v6756_v3 = vld [vmem:[#allocation8_spill] sm:$0xff]  ;;  %v6757_v22 = vld [vmem:[#allocation10_spill] sm:$0xff] }
 0x24a   : > { %v2483_v29 = vmax.f32 %v2451_v12, 0.0  ;;  %v4174_v5 = vpack.c.bf16 %v2453_v31, %v2452_v19  ;;  %v4179_v8 = vpack.c.bf16 %v2455_v28, %v2454_v49  ;;  %v4184_v55 = vpack.c.bf16 %v2457_v46, %v2456_v11  ;;  %v6758_v19 = vld [vmem:[#allocation7_spill] sm:$0xff]  ;;  %v6759_v49 = vld [vmem:[#allocation9_spill] sm:$0xff]  ;;  %v6760_v11 = vld [vmem:[#allocation12_spill] sm:$0xff] }
 0x24b   : > { %v4189_v2 = vpack.c.bf16 %v2459_v1, %v2458_v21  ;;  %v4194_v34 = vpack.c.bf16 %v2461_v33, %v2460_v30  ;;  %v4199_v38 = vpack.c.bf16 %v2463_v24, %v2462_v0  ;;  %v4204_v32 = vpack.c.bf16 %v2465_v50, %v2464_v25  ;;  %v6761_v0 = vld [vmem:[#allocation13_spill] sm:$0xff]  ;;  %v6762_v50 = vld [vmem:[#allocation16_spill] sm:$0xff] }
 0x24c   : > { %4175 = vst [vmem:[%s5948_s3] sm:$0xff] %v4174_v5   ;;  %4491 = vst [vmem:[%s5948_s3 + $0x8] sm:$0xff] %v4179_v8   ;;  %v4209_v36 = vpack.c.bf16 %v2467_v59, %v2466_v41  ;;  %v4214_v47 = vpack.c.bf16 %v2469_v42, %v2468_v17  ;;  %v4219_v54 = vpack.c.bf16 %v2471_v18, %v2470_v13  ;;  %v6752_v13 = vld [vmem:[#allocation4_spill] sm:$0xff]  ;;  %v6753_v41 = vld [vmem:[#allocation6_spill] sm:$0xff] }
 0x24d   : > { %4492 = vst [vmem:[%s5948_s3 + $0x10] sm:$0xff] %v4184_v55   ;;  %v4224_v44 = vpack.c.bf16 %v2473_v37, %v2472_v16  ;;  %4493 = vst [vmem:[%s5948_s3 + $0x18] sm:$0xff] %v4189_v2   ;;  %v4229_v1 = vpack.c.bf16 %v2475_v57, %v2474_v58  ;;  %v4234_v24 = vpack.c.bf16 %v2477_v62, %v2476_v7  ;;  %v6755_v58 = vld [vmem:[#allocation5_spill] sm:$0xff]  ;;  %v6763_v42 = vld [vmem:[#allocation18_spill] sm:$0xff] }
 0x24e   : > { %4494 = vst [vmem:[%s5948_s3 + $0x20] sm:$0xff] %v4194_v34   ;;  %4495 = vst [vmem:[%s5948_s3 + $0x28] sm:$0xff] %v4199_v38   ;;  %v4239_v33 = vpack.c.bf16 %v2479_v43, %v2478_v53  ;;  %v4244_v51 = vpack.c.bf16 %v2481_v40, %v2480_v14  ;;  %v4249_v17 = vpack.c.bf16 %v2483_v29, %v2482_v20  ;;  %v6764_v37 = vld [vmem:[#allocation15_spill] sm:$0xff]  ;;  %v6765_v62 = vld [vmem:[#allocation17_spill] sm:$0xff] }
 0x24f   : > { %4496 = vst [vmem:[%s5948_s3 + $0x30] sm:$0xff] %v4204_v32   ;;  %4497 = vst [vmem:[%s5948_s3 + $0x38] sm:$0xff] %v4209_v36   ;;  %v2676_v16 = vmul.f32 %v5821_v9, %v6752_v13  ;;  %v2677_v63 = vmul.f32 %v5821_v9, %v6753_v41  ;;  %v2678_v60 = vmul.f32 %v5821_v9, %v6754_v6  ;;  %v6766_v43 = vld [vmem:[#allocation20_spill] sm:$0xff]  ;;  %v6767_v14 = vld [vmem:[#allocation23_spill] sm:$0xff] }
 0x250   : > { %4498 = vst [vmem:[%s5948_s3 + $0x40] sm:$0xff] %v4214_v47   ;;  %4499 = vst [vmem:[%s5948_s3 + $0x48] sm:$0xff] %v4219_v54   ;;  %v2679_v7 = vmul.f32 %v5821_v9, %v6755_v58  ;;  %v2680_v15 = vmul.f32 %v5821_v9, %v6756_v3  ;;  %v2681_v12 = vmul.f32 %v5821_v9, %v6757_v22  ;;  %v6768_v40 = vld [vmem:[#allocation19_spill] sm:$0xff]  ;;  %v6769_v29 = vld [vmem:[#allocation22_spill] sm:$0xff] }
 0x251   : > { %4500 = vst [vmem:[%s5948_s3 + $0x50] sm:$0xff] %v4224_v44   ;;  %4501 = vst [vmem:[%s5948_s3 + $0x58] sm:$0xff] %v4229_v1   ;;  %v2682_v31 = vmul.f32 %v5821_v9, %v6758_v19  ;;  %v2683_v28 = vmul.f32 %v5821_v9, %v6759_v49  ;;  %v2684_v46 = vmul.f32 %v5821_v9, %v6760_v11  ;;  %v6770_v8 = vld [vmem:[#allocation27_spill] sm:$0xff]  ;;  %v6772_v32 = vld [vmem:[#allocation29_spill] sm:$0xff] }
 0x252   : > { %4502 = vst [vmem:[%s5948_s3 + $0x60] sm:$0xff] %v4234_v24   ;;  %4503 = vst [vmem:[%s5948_s3 + $0x68] sm:$0xff] %v4239_v33   ;;  %v2685_v21 = vmul.f32 %v5821_v9, %v6656_v52  ;;  %v2686_v30 = vmul.f32 %v5821_v9, %v6657_v35  ;;  %v2687_v25 = vmul.f32 %v5821_v9, %v6761_v0  ;;  %v6771_v2 = vld [vmem:[#allocation31_spill] sm:$0xff]  ;;  %v6775_v24 = vld [vmem:[#allocation33_spill] sm:$0xff] }
 0x253   : > { %4504 = vst [vmem:[%s5948_s3 + $0x70] sm:$0xff] %v4244_v51   ;;  %4505 = vst [vmem:[%s5948_s3 + $0x78] sm:$0xff] %v4249_v17   ;;  %v2688_v59 = vmul.f32 %v5821_v9, %v6762_v50  ;;  %v2689_v18 = vmul.f32 %v5821_v9, %v6763_v42  ;;  %v2690_v57 = vmul.f32 %v5821_v9, %v6764_v37  ;;  %v6773_v47 = vld [vmem:[#allocation35_spill] sm:$0xff]  ;;  %v6776_v51 = vld [vmem:[#allocation37_spill] sm:$0xff] }
 0x254   : > { %v2691_v53 = vmul.f32 %v5821_v9, %v6765_v62  ;;  %v2692_v52 = vmul.f32 %v5821_v9, %v6766_v43  ;;  %v2693_v35 = vmul.f32 %v5821_v9, %v6767_v14  ;;  %v2694_v20 = vmul.f32 %v5821_v9, %v6768_v40  ;;  %v6774_v44 = vld [vmem:[#allocation39_spill] sm:$0xff]  ;;  %v6779_v58 = vld [vmem:[#allocation41_spill] sm:$0xff] }
 0x255   : > { %v2695_v5 = vmul.f32 %v5821_v9, %v6769_v29  ;;  %v2696_v55 = vmul.f32 %v5821_v9, %v6770_v8  ;;  %v2697_v34 = vmul.f32 %v5821_v9, %v6771_v2  ;;  %v2698_v38 = vmul.f32 %v5821_v9, %v6677_v23  ;;  %v6777_v13 = vld [vmem:[#allocation43_spill] sm:$0xff]  ;;  %v6780_v22 = vld [vmem:[#allocation45_spill] sm:$0xff] }
 0x256   : > { %v2699_v36 = vmul.f32 %v5821_v9, %v6772_v32  ;;  %v2700_v54 = vmul.f32 %v5821_v9, %v6773_v47  ;;  %v2701_v1 = vmul.f32 %v5821_v9, %v6774_v44  ;;  %v2702_v33 = vmul.f32 %v5821_v9, %v6775_v24  ;;  %v6778_v6 = vld [vmem:[#allocation47_spill] sm:$0xff] }
 0x257   : > { %v2703_v17 = vmul.f32 %v5821_v9, %v6776_v51  ;;  %v2704_v41 = vmul.f32 %v5821_v9, %v6777_v13  ;;  %v2705_v23 = vmul.f32 %v5821_v9, %v6778_v6  ;;  %v2706_v3 = vmul.f32 %v5821_v9, %v6779_v58 }
 0x258   : > { %v2707_v19 = vmul.f32 %v5821_v9, %v6780_v22  ;;  %v6031_v49 = vadd.f32 %v2676_v16, %v5824_v61  ;;  %v6034_v11 = vadd.f32 %v2677_v63, %v5824_v61  ;;  %v6037_v0 = vadd.f32 %v2678_v60, %v5824_v61 }
 0x259   : > { %v6040_v50 = vadd.f32 %v2679_v7, %v5824_v61  ;;  %v6043_v42 = vadd.f32 %v2680_v15, %v5824_v61  ;;  %v2713_v37 = vadd.f32 %v2681_v12, %v5824_v61  ;;  %v2714_v62 = vadd.f32 %v2682_v31, %v5824_v61 }
 0x25a   : > { %v2715_v43 = vadd.f32 %v2683_v28, %v5824_v61  ;;  %v2716_v16 = vadd.f32 %v2684_v46, %v5824_v61  ;;  %v2717_v63 = vadd.f32 %v2685_v21, %v5824_v61  ;;  %v2718_v14 = vadd.f32 %v2686_v30, %v5824_v61 }
 0x25b   : > { %v2719_v60 = vadd.f32 %v2687_v25, %v5824_v61  ;;  %v2720_v7 = vadd.f32 %v2688_v59, %v5824_v61  ;;  %v2721_v40 = vadd.f32 %v2689_v18, %v5824_v61  ;;  %v2722_v15 = vadd.f32 %v2690_v57, %v5824_v61 }
 0x25c   : > { %v2723_v12 = vadd.f32 %v2691_v53, %v5824_v61  ;;  %v2724_v31 = vadd.f32 %v2692_v52, %v5824_v61  ;;  %v2725_v28 = vadd.f32 %v2693_v35, %v5824_v61  ;;  %v2726_v46 = vadd.f32 %v2694_v20, %v5824_v61 }
 0x25d   : > { %v2727_v21 = vadd.f32 %v2695_v5, %v5824_v61  ;;  %v2728_v30 = vadd.f32 %v2696_v55, %v5824_v61  ;;  %v2729_v25 = vadd.f32 %v2697_v34, %v5824_v61  ;;  %v2730_v59 = vadd.f32 %v2698_v38, %v5824_v61 }
 0x25e   : > { %v2731_v18 = vadd.f32 %v2699_v36, %v5824_v61  ;;  %v2732_v57 = vadd.f32 %v2700_v54, %v5824_v61  ;;  %v2733_v53 = vadd.f32 %v2701_v1, %v5824_v61  ;;  %v2734_v52 = vadd.f32 %v2702_v33, %v5824_v61 }
 0x25f   : > { %v2735_v35 = vadd.f32 %v2703_v17, %v5824_v61  ;;  %v2736_v20 = vadd.f32 %v2704_v41, %v5824_v61  ;;  %v2737_v29 = vadd.f32 %v2705_v23, %v5824_v61  ;;  %v2738_v5 = vadd.f32 %v2706_v3, %v5824_v61 }
 0x260   : > { %v2739_v8 = vadd.f32 %v2707_v19, %v5824_v61  ;;  %v2740_v55 = vmax.f32 %v6031_v49, 0.0  ;;  %v2741_v2 = vmax.f32 %v6034_v11, 0.0  ;;  %v2742_v34 = vmax.f32 %v6037_v0, 0.0 }
 0x261   : > { %v2743_v38 = vmax.f32 %v6040_v50, 0.0  ;;  %v2744_v32 = vmax.f32 %v6043_v42, 0.0  ;;  %v2745_v36 = vmax.f32 %v2713_v37, 0.0  ;;  %v2746_v47 = vmax.f32 %v2714_v62, 0.0 }
 0x262   : > { %v2747_v54 = vmax.f32 %v2715_v43, 0.0  ;;  %v2748_v44 = vmax.f32 %v2716_v16, 0.0  ;;  %v2749_v1 = vmax.f32 %v2717_v63, 0.0  ;;  %v2750_v24 = vmax.f32 %v2718_v14, 0.0 }
 0x263   : > { %v2751_v33 = vmax.f32 %v2719_v60, 0.0  ;;  %v2752_v51 = vmax.f32 %v2720_v7, 0.0  ;;  %v2753_v17 = vmax.f32 %v2721_v40, 0.0  ;;  %v2754_v13 = vmax.f32 %v2722_v15, 0.0 }
 0x264   : > { %v2755_v41 = vmax.f32 %v2723_v12, 0.0  ;;  %v2756_v6 = vmax.f32 %v2724_v31, 0.0  ;;  %v2757_v23 = vmax.f32 %v2725_v28, 0.0  ;;  %v2758_v58 = vmax.f32 %v2726_v46, 0.0 }
 0x265   : > { %v2759_v3 = vmax.f32 %v2727_v21, 0.0  ;;  %v2760_v22 = vmax.f32 %v2728_v30, 0.0  ;;  %v2761_v19 = vmax.f32 %v2729_v25, 0.0  ;;  %v2762_v49 = vmax.f32 %v2730_v59, 0.0 }
 0x266   : > { %v2763_v11 = vmax.f32 %v2731_v18, 0.0  ;;  %v2764_v0 = vmax.f32 %v2732_v57, 0.0  ;;  %v2765_v50 = vmax.f32 %v2733_v53, 0.0  ;;  %v2766_v42 = vmax.f32 %v2734_v52, 0.0  ;;  %v6781_v52 = vld [vmem:[#allocation50_spill] sm:$0xff] }
 0x267   : > { %v2767_v37 = vmax.f32 %v2735_v35, 0.0  ;;  %v2768_v62 = vmax.f32 %v2736_v20, 0.0  ;;  %v2769_v43 = vmax.f32 %v2737_v29, 0.0  ;;  %v2770_v16 = vmax.f32 %v2738_v5, 0.0  ;;  %v6782_v20 = vld [vmem:[#allocation54_spill] sm:$0xff]  ;;  %v6783_v5 = vld [vmem:[#allocation48_spill] sm:$0xff] }
 0x268   : > { %v2771_v63 = vmax.f32 %v2739_v8, 0.0  ;;  %v4254_v14 = vpack.c.bf16 %v2741_v2, %v2740_v55  ;;  %v4259_v60 = vpack.c.bf16 %v2743_v38, %v2742_v34  ;;  %v4264_v7 = vpack.c.bf16 %v2745_v36, %v2744_v32  ;;  %v6784_v55 = vld [vmem:[#allocation52_spill] sm:$0xff]  ;;  %v6785_v34 = vld [vmem:[#allocation58_spill] sm:$0xff] }
 0x269   : > { %v4269_v40 = vpack.c.bf16 %v2747_v54, %v2746_v47  ;;  %v4274_v15 = vpack.c.bf16 %v2749_v1, %v2748_v44  ;;  %v4279_v12 = vpack.c.bf16 %v2751_v33, %v2750_v24  ;;  %v4284_v31 = vpack.c.bf16 %v2753_v17, %v2752_v51  ;;  %v6786_v32 = vld [vmem:[#allocation62_spill] sm:$0xff]  ;;  %v6787_v47 = vld [vmem:[#allocation56_spill] sm:$0xff] }
 0x26a   : > { %4506 = vst [vmem:[%s5948_s3 + $0x80] sm:$0xff] %v4254_v14   ;;  %4507 = vst [vmem:[%s5948_s3 + $0x88] sm:$0xff] %v4259_v60   ;;  %v4289_v28 = vpack.c.bf16 %v2755_v41, %v2754_v13  ;;  %v4294_v46 = vpack.c.bf16 %v2757_v23, %v2756_v6  ;;  %v4299_v21 = vpack.c.bf16 %v2759_v3, %v2758_v58  ;;  %v6788_v44 = vld [vmem:[#allocation60_spill] sm:$0xff]  ;;  %v6789_v24 = vld [vmem:[#allocation66_spill] sm:$0xff] }
 0x26b   : > { %4508 = vst [vmem:[%s5948_s3 + $0x90] sm:$0xff] %v4264_v7   ;;  %v4304_v30 = vpack.c.bf16 %v2761_v19, %v2760_v22  ;;  %4509 = vst [vmem:[%s5948_s3 + $0x98] sm:$0xff] %v4269_v40   ;;  %v4309_v25 = vpack.c.bf16 %v2763_v11, %v2762_v49  ;;  %v4314_v59 = vpack.c.bf16 %v2765_v50, %v2764_v0  ;;  %v6790_v51 = vld [vmem:[#allocation70_spill] sm:$0xff]  ;;  %v6791_v13 = vld [vmem:[#allocation64_spill] sm:$0xff] }
 0x26c   : > { %4510 = vst [vmem:[%s5948_s3 + $0xa0] sm:$0xff] %v4274_v15   ;;  %4511 = vst [vmem:[%s5948_s3 + $0xa8] sm:$0xff] %v4279_v12   ;;  %v4319_v18 = vpack.c.bf16 %v2767_v37, %v2766_v42  ;;  %v4324_v57 = vpack.c.bf16 %v2769_v43, %v2768_v62  ;;  %v4329_v53 = vpack.c.bf16 %v2771_v63, %v2770_v16  ;;  %v6792_v6 = vld [vmem:[#allocation68_spill] sm:$0xff]  ;;  %v6793_v58 = vld [vmem:[#allocation74_spill] sm:$0xff] }
 0x26d   : > { %4512 = vst [vmem:[%s5948_s3 + $0xb0] sm:$0xff] %v4284_v31   ;;  %4513 = vst [vmem:[%s5948_s3 + $0xb8] sm:$0xff] %v4289_v28   ;;  %v2965_v35 = vmul.f32 %v5821_v9, %v6781_v52  ;;  %v2966_v29 = vmul.f32 %v5821_v9, %v6782_v20  ;;  %v2967_v8 = vmul.f32 %v5821_v9, %v6783_v5  ;;  %v6794_v22 = vld [vmem:[#allocation78_spill] sm:$0xff]  ;;  %v6797_v63 = vld [vmem:[#allocation92_spill] sm:$0xff] }
 0x26e   : > { %4514 = vst [vmem:[%s5948_s3 + $0xc0] sm:$0xff] %v4294_v46   ;;  %4515 = vst [vmem:[%s5948_s3 + $0xc8] sm:$0xff] %v4299_v21   ;;  %v2968_v2 = vmul.f32 %v5821_v9, %v6784_v55  ;;  %v2969_v38 = vmul.f32 %v5821_v9, %v6785_v34  ;;  %v2970_v36 = vmul.f32 %v5821_v9, %v6786_v32  ;;  %v6795_v0 = vld [vmem:[#allocation82_spill] sm:$0xff]  ;;  %v6800_v15 = vld [vmem:[#allocation96_spill] sm:$0xff] }
 0x26f   : > { %4516 = vst [vmem:[%s5948_s3 + $0xd0] sm:$0xff] %v4304_v30   ;;  %4517 = vst [vmem:[%s5948_s3 + $0xd8] sm:$0xff] %v4309_v25   ;;  %v2971_v54 = vmul.f32 %v5821_v9, %v6787_v47  ;;  %v2972_v1 = vmul.f32 %v5821_v9, %v6788_v44  ;;  %v2973_v33 = vmul.f32 %v5821_v9, %v6789_v24  ;;  %v6796_v42 = vld [vmem:[#allocation86_spill] sm:$0xff]  ;;  %v6801_v12 = vld [vmem:[#allocation100_spill] sm:$0xff] }
 0x270   : > { %4518 = vst [vmem:[%s5948_s3 + $0xe0] sm:$0xff] %v4314_v59   ;;  %4519 = vst [vmem:[%s5948_s3 + $0xe8] sm:$0xff] %v4319_v18   ;;  %v2974_v17 = vmul.f32 %v5821_v9, %v6790_v51  ;;  %v2975_v41 = vmul.f32 %v5821_v9, %v6791_v13  ;;  %v2976_v23 = vmul.f32 %v5821_v9, %v6792_v6  ;;  %v6798_v60 = vld [vmem:[#allocation98_spill] sm:$0xff]  ;;  %v6803_v28 = vld [vmem:[#allocation104_spill] sm:$0xff] }
 0x271   : > { %4520 = vst [vmem:[%s5948_s3 + $0xf0] sm:$0xff] %v4324_v57   ;;  %4521 = vst [vmem:[%s5948_s3 + $0xf8] sm:$0xff] %v4329_v53   ;;  %v2977_v3 = vmul.f32 %v5821_v9, %v6793_v58  ;;  %v2978_v19 = vmul.f32 %v5821_v9, %v6794_v22  ;;  %v2979_v49 = vmul.f32 %v5821_v9, %v6695_v26  ;;  %v6799_v40 = vld [vmem:[#allocation102_spill] sm:$0xff]  ;;  %v6804_v21 = vld [vmem:[#allocation108_spill] sm:$0xff] }
 0x272   : > { %v2980_v11 = vmul.f32 %v5821_v9, %v6696_v4  ;;  %v2981_v50 = vmul.f32 %v5821_v9, %v6795_v0  ;;  %v2982_v37 = vmul.f32 %v5821_v9, %v6796_v42  ;;  %v2983_v62 = vmul.f32 %v5821_v9, %v6702_v27  ;;  %v6802_v31 = vld [vmem:[#allocation110_spill] sm:$0xff] }
 0x273   : > { %v2984_v43 = vmul.f32 %v5821_v9, %v6704_v10  ;;  %v2985_v16 = vmul.f32 %v5821_v9, %v6706_v48  ;;  %v2986_v26 = vmul.f32 %v5821_v9, %v6708_v39  ;;  %v2987_v4 = vmul.f32 %v5821_v9, %v6710_v56 }
 0x274   : > { %v2988_v14 = vmul.f32 %v5821_v9, %v6797_v63  ;;  %v2989_v7 = vmul.f32 %v5821_v9, %v6798_v60  ;;  %v2990_v27 = vmul.f32 %v5821_v9, %v6799_v40  ;;  %v2991_v10 = vmul.f32 %v5821_v9, %v6800_v15 }
 0x275   : > { %v2992_v48 = vmul.f32 %v5821_v9, %v6801_v12  ;;  %v2993_v39 = vmul.f32 %v5821_v9, %v6722_v45  ;;  %v2994_v56 = vmul.f32 %v5821_v9, %v6802_v31  ;;  %v2995_v46 = vmul.f32 %v5821_v9, %v6803_v28 }
 0x276   : > { %v2996_v30 = vmul.f32 %v5821_v9, %v6804_v21  ;;  %v6158_v25 = vadd.f32 %v2965_v35, %v5824_v61  ;;  %v6161_v59 = vadd.f32 %v2966_v29, %v5824_v61  ;;  %v6164_v18 = vadd.f32 %v2967_v8, %v5824_v61 }
 0x277   : > { %v6167_v45 = vadd.f32 %v2968_v2, %v5824_v61  ;;  %v6170_v57 = vadd.f32 %v2969_v38, %v5824_v61  ;;  %v3002_v53 = vadd.f32 %v2970_v36, %v5824_v61  ;;  %v3003_v52 = vadd.f32 %v2971_v54, %v5824_v61 }
 0x278   : > { %v3004_v20 = vadd.f32 %v2972_v1, %v5824_v61  ;;  %v3005_v35 = vadd.f32 %v2973_v33, %v5824_v61  ;;  %v3006_v29 = vadd.f32 %v2974_v17, %v5824_v61  ;;  %v3007_v5 = vadd.f32 %v2975_v41, %v5824_v61 }
 0x279   : > { %v3008_v8 = vadd.f32 %v2976_v23, %v5824_v61  ;;  %v3009_v55 = vadd.f32 %v2977_v3, %v5824_v61  ;;  %v3010_v2 = vadd.f32 %v2978_v19, %v5824_v61  ;;  %v3011_v34 = vadd.f32 %v2979_v49, %v5824_v61 }
 0x27a   : > { %v3012_v38 = vadd.f32 %v2980_v11, %v5824_v61  ;;  %v3013_v32 = vadd.f32 %v2981_v50, %v5824_v61  ;;  %v3014_v36 = vadd.f32 %v2982_v37, %v5824_v61  ;;  %v3015_v47 = vadd.f32 %v2983_v62, %v5824_v61 }
 0x27b   : > { %v3016_v54 = vadd.f32 %v2984_v43, %v5824_v61  ;;  %v3017_v44 = vadd.f32 %v2985_v16, %v5824_v61  ;;  %v3018_v1 = vadd.f32 %v2986_v26, %v5824_v61  ;;  %v3019_v24 = vadd.f32 %v2987_v4, %v5824_v61 }
 0x27c   : > { %v3020_v33 = vadd.f32 %v2988_v14, %v5824_v61  ;;  %v3021_v51 = vadd.f32 %v2989_v7, %v5824_v61  ;;  %v3022_v17 = vadd.f32 %v2990_v27, %v5824_v61  ;;  %v3023_v13 = vadd.f32 %v2991_v10, %v5824_v61 }
 0x27d   : > { %v3024_v41 = vadd.f32 %v2992_v48, %v5824_v61  ;;  %v3025_v6 = vadd.f32 %v2993_v39, %v5824_v61  ;;  %v3026_v23 = vadd.f32 %v2994_v56, %v5824_v61  ;;  %v3027_v58 = vadd.f32 %v2995_v46, %v5824_v61 }
 0x27e   : > { %v3028_v3 = vadd.f32 %v2996_v30, %v5824_v61  ;;  %v3029_v22 = vmax.f32 %v6158_v25, 0.0  ;;  %v3030_v19 = vmax.f32 %v6161_v59, 0.0  ;;  %v3031_v49 = vmax.f32 %v6164_v18, 0.0 }
 0x27f   : > { %v3032_v11 = vmax.f32 %v6167_v45, 0.0  ;;  %v3033_v0 = vmax.f32 %v6170_v57, 0.0  ;;  %v3034_v50 = vmax.f32 %v3002_v53, 0.0  ;;  %v3035_v42 = vmax.f32 %v3003_v52, 0.0 }
 0x280   : > { %v3036_v37 = vmax.f32 %v3004_v20, 0.0  ;;  %v3037_v62 = vmax.f32 %v3005_v35, 0.0  ;;  %v3038_v43 = vmax.f32 %v3006_v29, 0.0  ;;  %v3039_v16 = vmax.f32 %v3007_v5, 0.0 }
 0x281   : > { %v3040_v26 = vmax.f32 %v3008_v8, 0.0  ;;  %v3041_v4 = vmax.f32 %v3009_v55, 0.0  ;;  %v3042_v63 = vmax.f32 %v3010_v2, 0.0  ;;  %v3043_v14 = vmax.f32 %v3011_v34, 0.0 }
 0x282   : > { %v3044_v60 = vmax.f32 %v3012_v38, 0.0  ;;  %v3045_v7 = vmax.f32 %v3013_v32, 0.0  ;;  %v3046_v40 = vmax.f32 %v3014_v36, 0.0  ;;  %v3047_v27 = vmax.f32 %v3015_v47, 0.0  ;;  %v6805_v47 = vld [vmem:[#allocation51_spill] sm:$0xff] }
 0x283   : > { %v3048_v15 = vmax.f32 %v3016_v54, 0.0  ;;  %v3049_v10 = vmax.f32 %v3017_v44, 0.0  ;;  %v3050_v12 = vmax.f32 %v3018_v1, 0.0  ;;  %v3051_v48 = vmax.f32 %v3019_v24, 0.0  ;;  %v6806_v44 = vld [vmem:[#allocation55_spill] sm:$0xff]  ;;  %v6807_v24 = vld [vmem:[#allocation49_spill] sm:$0xff] }
 0x284   : > { %v3052_v39 = vmax.f32 %v3020_v33, 0.0  ;;  %v3053_v31 = vmax.f32 %v3021_v51, 0.0  ;;  %v3054_v56 = vmax.f32 %v3022_v17, 0.0  ;;  %v3055_v28 = vmax.f32 %v3023_v13, 0.0  ;;  %v6808_v51 = vld [vmem:[#allocation53_spill] sm:$0xff]  ;;  %v6809_v13 = vld [vmem:[#allocation59_spill] sm:$0xff] }
 0x285   : > { %v3056_v46 = vmax.f32 %v3024_v41, 0.0  ;;  %v3057_v21 = vmax.f32 %v3025_v6, 0.0  ;;  %v3058_v30 = vmax.f32 %v3026_v23, 0.0  ;;  %v3059_v25 = vmax.f32 %v3027_v58, 0.0  ;;  %v6810_v6 = vld [vmem:[#allocation63_spill] sm:$0xff]  ;;  %v6811_v58 = vld [vmem:[#allocation57_spill] sm:$0xff] }
 0x286   : > { %v3060_v59 = vmax.f32 %v3028_v3, 0.0  ;;  %v4334_v18 = vpack.c.bf16 %v3030_v19, %v3029_v22  ;;  %v4339_v45 = vpack.c.bf16 %v3032_v11, %v3031_v49  ;;  %v4344_v57 = vpack.c.bf16 %v3034_v50, %v3033_v0  ;;  %v6812_v22 = vld [vmem:[#allocation61_spill] sm:$0xff]  ;;  %v6813_v49 = vld [vmem:[#allocation67_spill] sm:$0xff] }
 0x287   : > { %v4349_v53 = vpack.c.bf16 %v3036_v37, %v3035_v42  ;;  %v4354_v52 = vpack.c.bf16 %v3038_v43, %v3037_v62  ;;  %v4359_v20 = vpack.c.bf16 %v3040_v26, %v3039_v16  ;;  %v4364_v35 = vpack.c.bf16 %v3042_v63, %v3041_v4  ;;  %v6814_v0 = vld [vmem:[#allocation71_spill] sm:$0xff]  ;;  %v6815_v42 = vld [vmem:[#allocation65_spill] sm:$0xff] }
 0x288   : > { %4522 = vst [vmem:[%s5948_s3 + $0x100] sm:$0xff] %v4334_v18   ;;  %4523 = vst [vmem:[%s5948_s3 + $0x108] sm:$0xff] %v4339_v45   ;;  %v4369_v29 = vpack.c.bf16 %v3044_v60, %v3043_v14  ;;  %v4374_v5 = vpack.c.bf16 %v3046_v40, %v3045_v7  ;;  %v4379_v8 = vpack.c.bf16 %v3048_v15, %v3047_v27  ;;  %v6816_v62 = vld [vmem:[#allocation69_spill] sm:$0xff]  ;;  %v6817_v16 = vld [vmem:[#allocation75_spill] sm:$0xff] }
 0x289   : > { %4524 = vst [vmem:[%s5948_s3 + $0x110] sm:$0xff] %v4344_v57   ;;  %v4384_v55 = vpack.c.bf16 %v3050_v12, %v3049_v10  ;;  %4525 = vst [vmem:[%s5948_s3 + $0x118] sm:$0xff] %v4349_v53   ;;  %v4389_v2 = vpack.c.bf16 %v3052_v39, %v3051_v48  ;;  %v4394_v34 = vpack.c.bf16 %v3054_v56, %v3053_v31  ;;  %v6818_v4 = vld [vmem:[#allocation79_spill] sm:$0xff]  ;;  %v6819_v14 = vld [vmem:[#allocation73_spill] sm:$0xff] }
 0x28a   : > { %4526 = vst [vmem:[%s5948_s3 + $0x120] sm:$0xff] %v4354_v52   ;;  %4527 = vst [vmem:[%s5948_s3 + $0x128] sm:$0xff] %v4359_v20   ;;  %v4399_v38 = vpack.c.bf16 %v3056_v46, %v3055_v28  ;;  %v4404_v32 = vpack.c.bf16 %v3058_v30, %v3057_v21  ;;  %v4409_v36 = vpack.c.bf16 %v3060_v59, %v3059_v25  ;;  %v6820_v7 = vld [vmem:[#allocation77_spill] sm:$0xff]  ;;  %v6821_v27 = vld [vmem:[#allocation83_spill] sm:$0xff] }
 0x28b   : > { %4528 = vst [vmem:[%s5948_s3 + $0x130] sm:$0xff] %v4364_v35   ;;  %4529 = vst [vmem:[%s5948_s3 + $0x138] sm:$0xff] %v4369_v29   ;;  %v3254_v54 = vmul.f32 %v5821_v9, %v6805_v47  ;;  %v3255_v1 = vmul.f32 %v5821_v9, %v6806_v44  ;;  %v3256_v33 = vmul.f32 %v5821_v9, %v6807_v24  ;;  %v6822_v10 = vld [vmem:[#allocation87_spill] sm:$0xff]  ;;  %v6823_v48 = vld [vmem:[#allocation81_spill] sm:$0xff] }
 0x28c   : > { %4530 = vst [vmem:[%s5948_s3 + $0x140] sm:$0xff] %v4374_v5   ;;  %4531 = vst [vmem:[%s5948_s3 + $0x148] sm:$0xff] %v4379_v8   ;;  %v3257_v17 = vmul.f32 %v5821_v9, %v6808_v51  ;;  %v3258_v41 = vmul.f32 %v5821_v9, %v6809_v13  ;;  %v3259_v23 = vmul.f32 %v5821_v9, %v6810_v6  ;;  %v6824_v31 = vld [vmem:[#allocation85_spill] sm:$0xff]  ;;  %v6825_v28 = vld [vmem:[#allocation91_spill] sm:$0xff] }
 0x28d   : > { %4532 = vst [vmem:[%s5948_s3 + $0x150] sm:$0xff] %v4384_v55   ;;  %4533 = vst [vmem:[%s5948_s3 + $0x158] sm:$0xff] %v4389_v2   ;;  %v3260_v3 = vmul.f32 %v5821_v9, %v6811_v58  ;;  %v3261_v19 = vmul.f32 %v5821_v9, %v6812_v22  ;;  %v3262_v11 = vmul.f32 %v5821_v9, %v6813_v49  ;;  %v6826_v21 = vld [vmem:[#allocation95_spill] sm:$0xff]  ;;  %v6827_v25 = vld [vmem:[#allocation89_spill] sm:$0xff] }
 0x28e   : > { %4534 = vst [vmem:[%s5948_s3 + $0x160] sm:$0xff] %v4394_v34   ;;  %4535 = vst [vmem:[%s5948_s3 + $0x168] sm:$0xff] %v4399_v38   ;;  %v3263_v50 = vmul.f32 %v5821_v9, %v6814_v0  ;;  %v3264_v37 = vmul.f32 %v5821_v9, %v6815_v42  ;;  %v3265_v43 = vmul.f32 %v5821_v9, %v6816_v62  ;;  %v6828_v18 = vld [vmem:[#allocation93_spill] sm:$0xff]  ;;  %v6829_v57 = vld [vmem:[#allocation99_spill] sm:$0xff] }
 0x28f   : > { %4536 = vst [vmem:[%s5948_s3 + $0x170] sm:$0xff] %v4404_v32   ;;  %4537 = vst [vmem:[%s5948_s3 + $0x178] sm:$0xff] %v4409_v36   ;;  %v3266_v26 = vmul.f32 %v5821_v9, %v6817_v16  ;;  %v3267_v63 = vmul.f32 %v5821_v9, %v6818_v4  ;;  %v3268_v60 = vmul.f32 %v5821_v9, %v6819_v14  ;;  %v6830_v52 = vld [vmem:[#allocation103_spill] sm:$0xff]  ;;  %v6831_v35 = vld [vmem:[#allocation97_spill] sm:$0xff] }
 0x290   : > { %v3269_v40 = vmul.f32 %v5821_v9, %v6820_v7  ;;  %v3270_v15 = vmul.f32 %v5821_v9, %v6821_v27  ;;  %v3271_v12 = vmul.f32 %v5821_v9, %v6822_v10  ;;  %v3272_v39 = vmul.f32 %v5821_v9, %v6823_v48  ;;  %v6832_v5 = vld [vmem:[#allocation101_spill] sm:$0xff]  ;;  %v6833_v55 = vld [vmem:[#allocation107_spill] sm:$0xff] }
 0x291   : > { %v3273_v56 = vmul.f32 %v5821_v9, %v6824_v31  ;;  %v3274_v46 = vmul.f32 %v5821_v9, %v6825_v28  ;;  %v3275_v30 = vmul.f32 %v5821_v9, %v6826_v21  ;;  %v3276_v59 = vmul.f32 %v5821_v9, %v6827_v25  ;;  %v6834_v34 = vld [vmem:[#allocation111_spill] sm:$0xff]  ;;  %v6835_v32 = vld [vmem:[#allocation105_spill] sm:$0xff] }
 0x292   : > { %v3277_v45 = vmul.f32 %v5821_v9, %v6828_v18  ;;  %v3278_v53 = vmul.f32 %v5821_v9, %v6829_v57  ;;  %v3279_v20 = vmul.f32 %v5821_v9, %v6830_v52  ;;  %v3280_v29 = vmul.f32 %v5821_v9, %v6831_v35  ;;  %v6836_v47 = vld [vmem:[#allocation109_spill] sm:$0xff] }
 0x293   : > { %v3281_v8 = vmul.f32 %v5821_v9, %v6832_v5  ;;  %v3282_v2 = vmul.f32 %v5821_v9, %v6833_v55  ;;  %v3283_v38 = vmul.f32 %v5821_v9, %v6834_v34  ;;  %v3284_v36 = vmul.f32 %v5821_v9, %v6835_v32 }
 0x294   : > { %v3285_v44 = vmul.f32 %v5821_v9, %v6836_v47  ;;  %v6285_v24 = vadd.f32 %v3254_v54, %v5824_v61  ;;  %v6288_v51 = vadd.f32 %v3255_v1, %v5824_v61  ;;  %v6291_v13 = vadd.f32 %v3256_v33, %v5824_v61 }
 0x295   : > { %v6294_v6 = vadd.f32 %v3257_v17, %v5824_v61  ;;  %v6297_v58 = vadd.f32 %v3258_v41, %v5824_v61  ;;  %v3291_v22 = vadd.f32 %v3259_v23, %v5824_v61  ;;  %v3292_v49 = vadd.f32 %v3260_v3, %v5824_v61 }
 0x296   : > { %v3293_v9 = vadd.f32 %v3261_v19, %v5824_v61  ;;  %v3294_v54 = vadd.f32 %v3262_v11, %v5824_v61  ;;  %v3295_v1 = vadd.f32 %v3263_v50, %v5824_v61  ;;  %v3296_v0 = vadd.f32 %v3264_v37, %v5824_v61 }
 0x297   : > { %v3297_v33 = vadd.f32 %v3265_v43, %v5824_v61  ;;  %v3298_v17 = vadd.f32 %v3266_v26, %v5824_v61  ;;  %v3299_v42 = vadd.f32 %v3267_v63, %v5824_v61  ;;  %v3300_v41 = vadd.f32 %v3268_v60, %v5824_v61 }
 0x298   : > { %v3301_v23 = vadd.f32 %v3269_v40, %v5824_v61  ;;  %v3302_v3 = vadd.f32 %v3270_v15, %v5824_v61  ;;  %v3303_v19 = vadd.f32 %v3271_v12, %v5824_v61  ;;  %v3304_v11 = vadd.f32 %v3272_v39, %v5824_v61 }
 0x299   : > { %v3305_v50 = vadd.f32 %v3273_v56, %v5824_v61  ;;  %v3306_v37 = vadd.f32 %v3274_v46, %v5824_v61  ;;  %v3307_v62 = vadd.f32 %v3275_v30, %v5824_v61  ;;  %v3308_v43 = vadd.f32 %v3276_v59, %v5824_v61 }
 0x29a   : > { %v3309_v16 = vadd.f32 %v3277_v45, %v5824_v61  ;;  %v3310_v26 = vadd.f32 %v3278_v53, %v5824_v61  ;;  %v3311_v4 = vadd.f32 %v3279_v20, %v5824_v61  ;;  %v3312_v63 = vadd.f32 %v3280_v29, %v5824_v61 }
 0x29b   : > { %v3313_v14 = vadd.f32 %v3281_v8, %v5824_v61  ;;  %v3314_v60 = vadd.f32 %v3282_v2, %v5824_v61  ;;  %v3315_v7 = vadd.f32 %v3283_v38, %v5824_v61  ;;  %v3316_v40 = vadd.f32 %v3284_v36, %v5824_v61 }
 0x29c   : > { %v3317_v27 = vadd.f32 %v3285_v44, %v5824_v61  ;;  %v3318_v15 = vmax.f32 %v6285_v24, 0.0  ;;  %v3319_v10 = vmax.f32 %v6288_v51, 0.0  ;;  %v3320_v12 = vmax.f32 %v6291_v13, 0.0 }
 0x29d   : > { %v3321_v48 = vmax.f32 %v6294_v6, 0.0  ;;  %v3322_v39 = vmax.f32 %v6297_v58, 0.0  ;;  %v3323_v31 = vmax.f32 %v3291_v22, 0.0  ;;  %v3324_v56 = vmax.f32 %v3292_v49, 0.0 }
 0x29e   : > { %v3325_v28 = vmax.f32 %v3293_v9, 0.0  ;;  %v3326_v46 = vmax.f32 %v3294_v54, 0.0  ;;  %v3327_v21 = vmax.f32 %v3295_v1, 0.0  ;;  %v3328_v30 = vmax.f32 %v3296_v0, 0.0 }
 0x29f   : > { %v3329_v25 = vmax.f32 %v3297_v33, 0.0  ;;  %v3330_v59 = vmax.f32 %v3298_v17, 0.0  ;;  %v3331_v18 = vmax.f32 %v3299_v42, 0.0  ;;  %v3332_v61 = vmax.f32 %v3300_v41, 0.0 }
 0x2a0   : > { %v3333_v45 = vmax.f32 %v3301_v23, 0.0  ;;  %v3334_v57 = vmax.f32 %v3302_v3, 0.0  ;;  %v3335_v53 = vmax.f32 %v3303_v19, 0.0  ;;  %v3336_v52 = vmax.f32 %v3304_v11, 0.0 }
 0x2a1   : > { %v3337_v20 = vmax.f32 %v3305_v50, 0.0  ;;  %v3338_v35 = vmax.f32 %v3306_v37, 0.0  ;;  %v3339_v29 = vmax.f32 %v3307_v62, 0.0  ;;  %v3340_v5 = vmax.f32 %v3308_v43, 0.0 }
 0x2a2   : > { %v3341_v8 = vmax.f32 %v3309_v16, 0.0  ;;  %v3342_v55 = vmax.f32 %v3310_v26, 0.0  ;;  %v3343_v2 = vmax.f32 %v3311_v4, 0.0  ;;  %v3344_v34 = vmax.f32 %v3312_v63, 0.0 }
 0x2a3   : > { %v3345_v38 = vmax.f32 %v3313_v14, 0.0  ;;  %v3346_v32 = vmax.f32 %v3314_v60, 0.0  ;;  %v3347_v36 = vmax.f32 %v3315_v7, 0.0  ;;  %v3348_v47 = vmax.f32 %v3316_v40, 0.0 }
 0x2a4   : > { %v3349_v44 = vmax.f32 %v3317_v27, 0.0  ;;  %v4414_v24 = vpack.c.bf16 %v3319_v10, %v3318_v15  ;;  %v4419_v51 = vpack.c.bf16 %v3321_v48, %v3320_v12  ;;  %v4424_v13 = vpack.c.bf16 %v3323_v31, %v3322_v39 }
 0x2a5   : > { %v4429_v6 = vpack.c.bf16 %v3325_v28, %v3324_v56  ;;  %v4434_v58 = vpack.c.bf16 %v3327_v21, %v3326_v46  ;;  %v4439_v22 = vpack.c.bf16 %v3329_v25, %v3328_v30  ;;  %v4444_v49 = vpack.c.bf16 %v3331_v18, %v3330_v59 }
 0x2a6   : > { %4538 = vst [vmem:[%s5948_s3 + $0x180] sm:$0xff] %v4414_v24   ;;  %4539 = vst [vmem:[%s5948_s3 + $0x188] sm:$0xff] %v4419_v51   ;;  %v4449_v9 = vpack.c.bf16 %v3333_v45, %v3332_v61  ;;  %v4454_v54 = vpack.c.bf16 %v3335_v53, %v3334_v57  ;;  %v4459_v1 = vpack.c.bf16 %v3337_v20, %v3336_v52 }
 0x2a7   : > { %4540 = vst [vmem:[%s5948_s3 + $0x190] sm:$0xff] %v4424_v13   ;;  %v4464_v0 = vpack.c.bf16 %v3339_v29, %v3338_v35  ;;  %4541 = vst [vmem:[%s5948_s3 + $0x198] sm:$0xff] %v4429_v6   ;;  %v4469_v33 = vpack.c.bf16 %v3341_v8, %v3340_v5  ;;  %v4474_v17 = vpack.c.bf16 %v3343_v2, %v3342_v55 }
 0x2a8   : > { %4542 = vst [vmem:[%s5948_s3 + $0x1a0] sm:$0xff] %v4434_v58   ;;  %4543 = vst [vmem:[%s5948_s3 + $0x1a8] sm:$0xff] %v4439_v22   ;;  %v4479_v42 = vpack.c.bf16 %v3345_v38, %v3344_v34  ;;  %v4484_v41 = vpack.c.bf16 %v3347_v36, %v3346_v32  ;;  %v4489_v23 = vpack.c.bf16 %v3349_v44, %v3348_v47 }
 0x2a9   : > { %4544 = vst [vmem:[%s5948_s3 + $0x1b0] sm:$0xff] %v4444_v49   ;;  %4545 = vst [vmem:[%s5948_s3 + $0x1b8] sm:$0xff] %v4449_v9  }
 0x2aa   : > { %4546 = vst [vmem:[%s5948_s3 + $0x1c0] sm:$0xff] %v4454_v54   ;;  %4547 = vst [vmem:[%s5948_s3 + $0x1c8] sm:$0xff] %v4459_v1  }
 0x2ab   : > { %4548 = vst [vmem:[%s5948_s3 + $0x1d0] sm:$0xff] %v4464_v0   ;;  %4549 = vst [vmem:[%s5948_s3 + $0x1d8] sm:$0xff] %v4469_v33  }
 0x2ac   : > { %4550 = vst [vmem:[%s5948_s3 + $0x1e0] sm:$0xff] %v4474_v17   ;;  %4551 = vst [vmem:[%s5948_s3 + $0x1e8] sm:$0xff] %v4479_v42  }
 0x2ad   : > { %4552 = vst [vmem:[%s5948_s3 + $0x1f0] sm:$0xff] %v4484_v41   ;;  %4553 = vst [vmem:[%s5948_s3 + $0x1f8] sm:$0xff] %v4489_v23  }
 0x2ae PF: > { %s12_s9 = sadd.s32 1, %s4954_s9  }
 0x2af   : > { %p9_p4 = scmp.ge.s32.totalorder %s12_s9, 4  }
 0x2b1   :  { %11 = sbr.rel (!%p9_p4) target bundleno = 1 (0x1), region = 70 }

</bundles_post_ra>
